<compile_context>
chip_gen: v6e
topology: v6e:2x2x1
jax: 0.10.0
libtpu: 0.0.40
codegen_flags: <defaults>
</compile_context>

<pallas_src>
import functools

import jax
import jax.numpy as jnp
from jax.experimental import pallas as pl
from jax.experimental.pallas import tpu as pltpu


def _round_up(x, m):
    return ((x + m - 1) // m) * m


def _tpu_vmem_bytes():
    """Per-core VMEM capacity (conservative 64 MiB fallback == v7x size)."""
    try:
        info = pltpu.get_tpu_info()
        v = getattr(info, "vmem_capacity_bytes", None)
        if isinstance(v, int) and v > 0:
            return v
    except Exception:
        pass
    return 64 * 1024 * 1024


def _num_tensorcores_per_chip():
    """Best-effort TensorCore count per chip; defaults to 1 (no batch split)."""
    try:
        dev = jax.devices()[0]
    except Exception:
        return 1
    for attr in ("num_cores", "core_count", "num_cores_per_chip"):
        v = getattr(dev, attr, None)
        if isinstance(v, int) and 1 <= v <= 8:
            return v
    try:
        info = pltpu.get_tpu_info()
        for attr in ("num_cores", "tensorcores_per_chip", "num_tensorcores"):
            v = getattr(info, attr, None)
            if isinstance(v, int) and 1 <= v <= 8:
                return v
    except Exception:
        pass
    kind = (getattr(dev, "device_kind", "") or "").lower()
    # Only the v7x generation has 2 TensorCores per chip among supported targets.
    return 2 if "7" in kind else 1


def _psru_kernel(gi_ref, cf_ref, h0_ref, whh_ri_ref, whh_n_ref, bhhn_ref,
                 out_ref, *, cf_time_resident):
    """One grid step = one (batch_block, time_chunk) tile.

    gi_ref:     (T, BB, 3H)      bf16  precomputed input-side gates (+ folded biases)
    cf_ref:     (L_pad|T, BB, 1) f32   precomputed concen_factor (resident or chunked)
    h0_ref:     (BB, H)          f32   initial hidden state
    whh_ri_ref: (H, 2H)          bf16  recurrent weight (reset/input gates), transposed
    whh_n_ref:  (H, H)           bf16  recurrent weight (new gate), transposed
    bhhn_ref:   (1, H)           f32   "new"-gate part of b_hh (scaled by resetgate,
                                       so it cannot be folded into gi)
    out_ref:    (BB, H)          f32   resident hidden-state accumulator / final output
    """
    H = out_ref.shape[1]
    T = gi_ref.shape[0]
    t_chunk = pl.program_id(1)

    # Initialise the resident hidden state at the first time chunk of each
    # batch block.
    # TODO(synk): input_output_aliases(hidden -> out) could drop this one-time
    # copy, but Pallas does not guarantee output blocks are pre-loaded from the
    # aliased HBM buffer, so the explicit init is kept for correctness.
    @pl.when(t_chunk == 0)
    def _():
        out_ref[...] = h0_ref[...]

    whh_ri = whh_ri_ref[...]   # loop-invariant (H, 2H) bf16
    whh_n = whh_n_ref[...]     # loop-invariant (H, H)  bf16
    bhh_n = bhhn_ref[...]      # (1, H) f32

    # Global-timestep base for the resident cf layout; 0 when cf is per-chunk.
    t_base = t_chunk * T if cf_time_resident else 0

    # TODO(synk): holding w_hh stationary in MXU weight registers across the
    # loop (pltpu.matmul_push_rhs / matmul_acc_lhs / matmul_pop) would shave the
    # per-step weight-reload latency off the serial critical path on all gens.
    def step(t, h):
        h16 = h.astype(jnp.bfloat16)
        # Split matmuls: the r/i result feeds the sigmoids (EUP) which can
        # overlap the n-gate matmul push/pop.
        gh_ri = jnp.dot(h16, whh_ri, preferred_element_type=jnp.float32)  # (BB, 2H)
        gh_n = jnp.dot(h16, whh_n, preferred_element_type=jnp.float32)    # (BB, H)
        gi = gi_ref[t]                                                    # (BB, 3H) bf16
        resetgate = jax.nn.sigmoid(gi[:, 0 * H:1 * H] + gh_ri[:, 0 * H:1 * H])
        inputgate = jax.nn.sigmoid(gi[:, 1 * H:2 * H] + gh_ri[:, 1 * H:2 * H])
        newgate = jnp.tanh(gi[:, 2 * H:3 * H] + resetgate * (gh_n + bhh_n))
        cf = cf_ref[t_base + t]                                           # (BB, 1) f32
        # hy = h - concen_factor * inputgate * (h - newgate); padded tail steps
        # have cf == 0 and therefore leave h unchanged.
        return h - (cf * inputgate) * (h - newgate)

    out_ref[...] = jax.lax.fori_loop(0, T, step, out_ref[...],
                                     unroll=min(T, 8))


def psru_forward(all_inputs, hidden, all_concen, w_ih, w_hh, b_ih, b_hh):
    """all_inputs: (B, L, H); hidden: (B, H); all_concen: (B, L).
    w_ih, w_hh: (3H, H); b_ih, b_hh: (3H,).  Returns final hidden (B, H)."""
    B, L, H = all_inputs.shape
    if H % 128 != 0:
        raise ValueError("PSRU Pallas kernel requires hidden_size % 128 == 0")
    eps = 0.01

    vmem_bytes = _tpu_vmem_bytes()
    n_cores = _num_tensorcores_per_chip()

    # Batch blocking: split only when a second TensorCore exists to take it
    # (v7x / megacore); on single-TC chips a split would serialize the
    # recurrence twice.
    bb = B // 2 if (n_cores >= 2 and B >= 16 and B % 16 == 0) else B

    # Time chunking: as many timesteps per grid step as the VMEM budget allows
    # (gi is the dominant stream; it is double-buffered by the pipeline).
    step_gi_bytes = bb * 3 * H * 2                      # bf16
    gi_budget = min(vmem_bytes // 3, 32 * 1024 * 1024)  # leave ample headroom
    t_max = max(8, gi_budget // (2 * step_gi_bytes))
    t_max = min(t_max, 256)
    L8 = _round_up(L, 8)
    if L8 <= t_max:
        T = L8
    else:
        n_chunks = -(-L8 // t_max)
        T = _round_up(-(-L8 // n_chunks), 8)            # minimize tail padding
    L_pad = _round_up(L, T)

    # ---- glue / pre-pass (outside the serial recurrence) ----
    # Input-side gates for all timesteps in one big bf16 matmul (f32 accum),
    # produced directly in time-major layout, then streamed as bf16.
    x_t16 = jnp.transpose(all_inputs.astype(jnp.bfloat16), (1, 0, 2))  # (L, B, H)
    wih_t16 = jnp.transpose(w_ih).astype(jnp.bfloat16)                 # (H, 3H)
    # Fold b_ih plus the r/i parts of b_hh into the precomputed gates.
    bias = b_ih.astype(jnp.float32) + jnp.concatenate(
        [b_hh[:2 * H].astype(jnp.float32), jnp.zeros((H,), jnp.float32)])
    gi_all = (jnp.einsum("lbh,hg->lbg", x_t16, wih_t16,
                         preferred_element_type=jnp.float32)
              + bias).astype(jnp.bfloat16)                             # (L, B, 3H)

    # concen_factor = (c >= eps) * c, precomputed, time-major (L, B, 1).
    cf = jnp.where(all_concen >= eps, all_concen, 0.0).astype(jnp.float32)
    cf = jnp.transpose(cf)[:, :, None]

    if L_pad != L:
        gi_all = jnp.pad(gi_all, ((0, L_pad - L), (0, 0), (0, 0)))
        cf = jnp.pad(cf, ((0, L_pad - L), (0, 0), (0, 0)))  # cf=0 -> no-op step

    whh_t16 = jnp.transpose(w_hh).astype(jnp.bfloat16)      # (H, 3H)
    whh_ri = whh_t16[:, :2 * H]                             # (H, 2H)
    whh_n = whh_t16[:, 2 * H:]                              # (H, H)
    bhh_n = b_hh[2 * H:].reshape(1, H).astype(jnp.float32)  # (1, H)
    h0 = hidden.astype(jnp.float32)                         # (B, H)

    # concen_factor: time-resident (one DMA per batch block) when the lane-padded
    # footprint is small; otherwise delivered per time chunk.
    cf_resident = (2 * L_pad * bb * 128 * 4) <= (4 * 1024 * 1024)
    if cf_resident:
        cf_spec = pl.BlockSpec((L_pad, bb, 1), lambda b, t: (0, b, 0))
    else:
        cf_spec = pl.BlockSpec((T, bb, 1), lambda b, t: (t, b, 0))

    grid = (B // bb, L_pad // T)

    vmem_limit = int(min(vmem_bytes * 3 // 4, 96 * 1024 * 1024))
    vmem_limit = max(vmem_limit, 32 * 1024 * 1024)

    kernel = functools.partial(_psru_kernel, cf_time_resident=cf_resident)

    return pl.pallas_call(
        kernel,
        out_shape=jax.ShapeDtypeStruct((B, H), jnp.float32),
        grid_spec=pltpu.PrefetchScalarGridSpec(
            num_scalar_prefetch=0,
            grid=grid,
            in_specs=[
                pl.BlockSpec((T, bb, 3 * H), lambda b, t: (t, b, 0)),  # gi chunk (bf16)
                cf_spec,                                               # concen_factor
                pl.BlockSpec((bb, H), lambda b, t: (b, 0)),            # h0
                pl.BlockSpec((H, 2 * H), lambda b, t: (0, 0)),         # w_hh^T r/i (bf16)
                pl.BlockSpec((H, H), lambda b, t: (0, 0)),             # w_hh^T n   (bf16)
                pl.BlockSpec((1, H), lambda b, t: (0, 0)),             # b_hh_n
            ],
            out_specs=pl.BlockSpec((bb, H), lambda b, t: (b, 0)),      # resident h
        ),
        compiler_params=pltpu.CompilerParams(
            dimension_semantics=("parallel", "arbitrary"),
            vmem_limit_bytes=vmem_limit,
        ),
    )(gi_all, cf, h0, whh_ri, whh_n, bhh_n)


def psru_ref(all_inputs, hidden, all_concen, w_ih, w_hh, b_ih, b_hh):
    """Pure-JAX f32 reference mirroring the PyTorch module exactly."""
    L = all_inputs.shape[1]
    eps = 0.01
    for i in range(L):
        x = all_inputs[:, i, :]
        c = all_concen[:, i]
        gi = x @ w_ih.T + b_ih
        gh = hidden @ w_hh.T + b_hh
        i_r, i_i, i_n = jnp.split(gi, 3, axis=1)
        h_r, h_i, h_n = jnp.split(gh, 3, axis=1)
        resetgate = jax.nn.sigmoid(i_r + h_r)
        inputgate = jax.nn.sigmoid(i_i + h_i)
        newgate = jnp.tanh(i_n + resetgate * h_n)
        concen_factor = jnp.where(c >= eps, c, 0.0)[:, None]
        hidden = hidden - concen_factor * inputgate * (hidden - newgate)
    return hidden


def psru_ref_mixed(all_inputs, hidden, all_concen, w_ih, w_hh, b_ih, b_hh):
    """Reference matching the kernel's precision exactly (bf16 matmul operands,
    f32 accumulation, bf16 gi stream, f32 hidden state)."""
    B, L, H = all_inputs.shape
    eps = 0.01
    wih16 = w_ih.astype(jnp.bfloat16)
    whh16 = w_hh.astype(jnp.bfloat16)
    bias_fold = b_ih.astype(jnp.float32) + jnp.concatenate(
        [b_hh[:2 * H].astype(jnp.float32), jnp.zeros((H,), jnp.float32)])
    bhh_n = b_hh[2 * H:].astype(jnp.float32)[None, :]
    h = hidden.astype(jnp.float32)
    for i in range(L):
        x16 = all_inputs[:, i, :].astype(jnp.bfloat16)
        c = all_concen[:, i]
        gi = (jnp.dot(x16, wih16.T, preferred_element_type=jnp.float32)
              + bias_fold).astype(jnp.bfloat16).astype(jnp.float32)
        gh = jnp.dot(h.astype(jnp.bfloat16), whh16.T,
                     preferred_element_type=jnp.float32)
        i_r, i_i, i_n = jnp.split(gi, 3, axis=1)
        h_r, h_i, h_n = jnp.split(gh, 3, axis=1)
        resetgate = jax.nn.sigmoid(i_r + h_r)
        inputgate = jax.nn.sigmoid(i_i + h_i)
        newgate = jnp.tanh(i_n + resetgate * (h_n + bhh_n))
        cf = jnp.where(c >= eps, c, 0.0)[:, None]
        h = h - (cf * inputgate) * (h - newgate)
    return h


if __name__ == "__main__":
    B, L, H = 8, 6, 128  # batch, seq_len, hidden_size

    key = jax.random.PRNGKey(0)
    k1, k2, k3, k4, k5, k6, k7 = jax.random.split(key, 7)

    # Deterministic parameter init (uniform(-1/sqrt(H), 1/sqrt(H)), GRU-style).
    bound = 1.0 / (H ** 0.5)
    w_ih = jax.random.uniform(k1, (3 * H, H), jnp.float32, -bound, bound)
    w_hh = jax.random.uniform(k2, (3 * H, H), jnp.float32, -bound, bound)
    b_ih = jax.random.uniform(k3, (3 * H,), jnp.float32, -bound, bound)
    b_hh = jax.random.uniform(k4, (3 * H,), jnp.float32, -bound, bound)

    all_inputs = jax.random.normal(k5, (B, L, H), jnp.float32)
    hidden0 = jax.random.normal(k6, (B, H), jnp.float32)
    # Mix of values below/above eps=0.01 (including negatives) to exercise the mask.
    all_concen = jax.random.uniform(k7, (B, L), jnp.float32, -0.2, 1.0)

    psru_jit = jax.jit(psru_forward)
    out = psru_jit(all_inputs, hidden0, all_concen, w_ih, w_hh, b_ih, b_hh)
    out = jax.block_until_ready(out)
    assert out.shape == (B, H)

    # Tight check: reference with the same mixed precision as the kernel.
    ref_mixed = psru_ref_mixed(all_inputs, hidden0, all_concen,
                               w_ih, w_hh, b_ih, b_hh)
    err_mixed = jnp.max(jnp.abs(out - ref_mixed))
    assert jnp.allclose(out, ref_mixed, atol=5e-3, rtol=5e-3), (
        f"mixed-precision ref mismatch, max abs err {err_mixed}")

    # Loose check: pure-f32 PyTorch-equivalent reference (bounds bf16 drift).
    ref_f32 = psru_ref(all_inputs, hidden0, all_concen, w_ih, w_hh, b_ih, b_hh)
    err_f32 = jnp.max(jnp.abs(out - ref_f32))
    assert err_f32 < 0.2, f"f32 ref drift too large: {err_f32}"

    print("KERNEL_OK")
</pallas_src>

<mosaic_0001>
module attributes {stable_mosaic.version = 11 : i64} {
  func.func @_psru_kernel(%arg0: i32, %arg1: i32, %arg2: memref<8x8x384xbf16, #tpu.memory_space<vmem>>, %arg3: memref<8x8x1xf32, #tpu.memory_space<vmem>>, %arg4: memref<8x128xf32, #tpu.memory_space<vmem>>, %arg5: memref<128x256xbf16, #tpu.memory_space<vmem>>, %arg6: memref<128x128xbf16, #tpu.memory_space<vmem>>, %arg7: memref<1x128xf32, #tpu.memory_space<vmem>>, %arg8: memref<8x128xf32, #tpu.memory_space<vmem>>) attributes {dimension_semantics = [#tpu.dimension_semantics<parallel>, #tpu.dimension_semantics<arbitrary>], iteration_bounds = array<i64: 1, 1>, scalar_prefetch = 0 : i64, scratch_operands = 0 : i64, tpu.core_type = #tpu.core_type<tc>, window_params = [{transform_indices = @transform_0, window_bounds = array<i64: 8, 8, 384>}, {transform_indices = @transform_1, window_bounds = array<i64: 8, 8, 1>}, {transform_indices = @transform_2, window_bounds = array<i64: 8, 128>}, {pipeline_mode = #tpu.pipeline_mode<synchronous>, transform_indices = @transform_3, window_bounds = array<i64: 128, 256>}, {pipeline_mode = #tpu.pipeline_mode<synchronous>, transform_indices = @transform_4, window_bounds = array<i64: 128, 128>}, {pipeline_mode = #tpu.pipeline_mode<synchronous>, transform_indices = @transform_5, window_bounds = array<i64: 1, 128>}, {transform_indices = @transform_6, window_bounds = array<i64: 8, 128>}]} {
    %c0_i32 = arith.constant 0 : i32
    %0 = arith.cmpi eq, %arg1, %c0_i32 : i32
    %1 = arith.extui %0 : i1 to i32
    %c0_i32_0 = arith.constant 0 : i32
    %2 = arith.cmpi ne, %1, %c0_i32_0 : i32
    scf.if %2 {
      %c0_75 = arith.constant 0 : index
      %c0_76 = arith.constant 0 : index
      %329 = vector.load %arg4[%c0_75, %c0_76] : memref<8x128xf32, #tpu.memory_space<vmem>>, vector<8x128xf32>
      %c0_77 = arith.constant 0 : index
      %c0_78 = arith.constant 0 : index
      %330 = vector.load %arg8[%c0_77, %c0_78] : memref<8x128xf32, #tpu.memory_space<vmem>>, vector<8x128xf32>
      tpu.vector_store %arg8[%c0_77, %c0_78], %329 {strides = array<i32>} : memref<8x128xf32, #tpu.memory_space<vmem>>, vector<8x128xf32>,
    } else {
    }
    %c0 = arith.constant 0 : index
    %c0_1 = arith.constant 0 : index
    %3 = vector.load %arg5[%c0, %c0_1] : memref<128x256xbf16, #tpu.memory_space<vmem>>, vector<128x256xbf16>
    %c0_2 = arith.constant 0 : index
    %c0_3 = arith.constant 0 : index
    %4 = vector.load %arg6[%c0_2, %c0_3] : memref<128x128xbf16, #tpu.memory_space<vmem>>, vector<128x128xbf16>
    %c0_4 = arith.constant 0 : index
    %c0_5 = arith.constant 0 : index
    %5 = vector.load %arg7[%c0_4, %c0_5] : memref<1x128xf32, #tpu.memory_space<vmem>>, vector<1x128xf32>
    %c8_i32 = arith.constant 8 : i32
    %6 = arith.muli %arg1, %c8_i32 : i32
    %c0_6 = arith.constant 0 : index
    %c0_7 = arith.constant 0 : index
    %7 = vector.load %arg8[%c0_6, %c0_7] : memref<8x128xf32, #tpu.memory_space<vmem>>, vector<8x128xf32>
    %c0_i32_8 = arith.constant 0 : i32
    %8 = arith.truncf %7 : vector<8x128xf32> to vector<8x128xbf16>
    %cst = arith.constant dense<0.000000e+00> : vector<8x256xf32>
    %9 = tpu.matmul %8, %3, %cst {dimension_numbers = #tpu.dot_dimension_numbers<[1], [0], [0], [1], [0, 0, 1, 1], [], []>} : vector<8x128xbf16>, vector<128x256xbf16>, vector<8x256xf32> -> vector<8x256xf32>
    %cst_9 = arith.constant dense<0.000000e+00> : vector<8x128xf32>
    %10 = tpu.matmul %8, %4, %cst_9 {dimension_numbers = #tpu.dot_dimension_numbers<[1], [0], [0], [1], [0, 0, 1, 1], [], []>} : vector<8x128xbf16>, vector<128x128xbf16>, vector<8x128xf32> -> vector<8x128xf32>
    %11 = arith.index_cast %c0_i32_8 : i32 to index
    %c0_10 = arith.constant 0 : index
    %c0_11 = arith.constant 0 : index
    %12 = vector.load %arg2[%11, %c0_10, %c0_11] : memref<8x8x384xbf16, #tpu.memory_space<vmem>>, vector<1x8x384xbf16>
    %13 = vector.shape_cast %12 : vector<1x8x384xbf16> to vector<8x384xbf16>
    %14 = vector.extract_strided_slice %13 {offsets = [0, 0], sizes = [8, 128], strides = [1, 1]} : vector<8x384xbf16> to vector<8x128xbf16>
    %15 = vector.extract_strided_slice %9 {offsets = [0, 0], sizes = [8, 128], strides = [1, 1]} : vector<8x256xf32> to vector<8x128xf32>
    %16 = arith.extf %14 : vector<8x128xbf16> to vector<8x128xf32>
    %17 = arith.addf %16, %15 : vector<8x128xf32>
    %18 = arith.negf %17 : vector<8x128xf32>
    %19 = math.exp %18 : vector<8x128xf32>
    %cst_12 = arith.constant 1.000000e+00 : f32
    %20 = vector.broadcast %cst_12 : f32 to vector<8x128xf32>
    %21 = arith.addf %20, %19 : vector<8x128xf32>
    %22 = arith.divf %20, %21 : vector<8x128xf32>
    %23 = vector.extract_strided_slice %13 {offsets = [0, 128], sizes = [8, 128], strides = [1, 1]} : vector<8x384xbf16> to vector<8x128xbf16>
    %24 = vector.extract_strided_slice %9 {offsets = [0, 128], sizes = [8, 128], strides = [1, 1]} : vector<8x256xf32> to vector<8x128xf32>
    %25 = arith.extf %23 : vector<8x128xbf16> to vector<8x128xf32>
    %26 = arith.addf %25, %24 : vector<8x128xf32>
    %27 = arith.negf %26 : vector<8x128xf32>
    %28 = math.exp %27 : vector<8x128xf32>
    %cst_13 = arith.constant 1.000000e+00 : f32
    %29 = vector.broadcast %cst_13 : f32 to vector<8x128xf32>
    %30 = arith.addf %29, %28 : vector<8x128xf32>
    %31 = arith.divf %29, %30 : vector<8x128xf32>
    %32 = vector.extract_strided_slice %13 {offsets = [0, 256], sizes = [8, 128], strides = [1, 1]} : vector<8x384xbf16> to vector<8x128xbf16>
    %33 = vector.broadcast %5 : vector<1x128xf32> to vector<8x128xf32>
    %34 = arith.addf %10, %33 : vector<8x128xf32>
    %35 = arith.mulf %22, %34 : vector<8x128xf32>
    %36 = arith.extf %32 : vector<8x128xbf16> to vector<8x128xf32>
    %37 = arith.addf %36, %35 : vector<8x128xf32>
    %38 = math.tanh %37 : vector<8x128xf32>
    %39 = arith.addi %6, %c0_i32_8 : i32
    %40 = arith.index_cast %39 : i32 to index
    %c0_14 = arith.constant 0 : index
    %c0_15 = arith.constant 0 : index
    %41 = vector.load %arg3[%40, %c0_14, %c0_15] : memref<8x8x1xf32, #tpu.memory_space<vmem>>, vector<1x8x1xf32>
    %42 = vector.shape_cast %41 : vector<1x8x1xf32> to vector<8x1xf32>
    %43 = vector.broadcast %42 : vector<8x1xf32> to vector<8x128xf32>
    %44 = arith.mulf %43, %31 : vector<8x128xf32>
    %45 = arith.subf %7, %38 : vector<8x128xf32>
    %46 = arith.mulf %44, %45 : vector<8x128xf32>
    %47 = arith.subf %7, %46 : vector<8x128xf32>
    %c1_i32 = arith.constant 1 : i32
    %48 = arith.truncf %47 : vector<8x128xf32> to vector<8x128xbf16>
    %cst_16 = arith.constant dense<0.000000e+00> : vector<8x256xf32>
    %49 = tpu.matmul %48, %3, %cst_16 {dimension_numbers = #tpu.dot_dimension_numbers<[1], [0], [0], [1], [0, 0, 1, 1], [], []>} : vector<8x128xbf16>, vector<128x256xbf16>, vector<8x256xf32> -> vector<8x256xf32>
    %cst_17 = arith.constant dense<0.000000e+00> : vector<8x128xf32>
    %50 = tpu.matmul %48, %4, %cst_17 {dimension_numbers = #tpu.dot_dimension_numbers<[1], [0], [0], [1], [0, 0, 1, 1], [], []>} : vector<8x128xbf16>, vector<128x128xbf16>, vector<8x128xf32> -> vector<8x128xf32>
    %51 = arith.index_cast %c1_i32 : i32 to index
    %c0_18 = arith.constant 0 : index
    %c0_19 = arith.constant 0 : index
    %52 = vector.load %arg2[%51, %c0_18, %c0_19] : memref<8x8x384xbf16, #tpu.memory_space<vmem>>, vector<1x8x384xbf16>
    %53 = vector.shape_cast %52 : vector<1x8x384xbf16> to vector<8x384xbf16>
    %54 = vector.extract_strided_slice %53 {offsets = [0, 0], sizes = [8, 128], strides = [1, 1]} : vector<8x384xbf16> to vector<8x128xbf16>
    %55 = vector.extract_strided_slice %49 {offsets = [0, 0], sizes = [8, 128], strides = [1, 1]} : vector<8x256xf32> to vector<8x128xf32>
    %56 = arith.extf %54 : vector<8x128xbf16> to vector<8x128xf32>
    %57 = arith.addf %56, %55 : vector<8x128xf32>
    %58 = arith.negf %57 : vector<8x128xf32>
    %59 = math.exp %58 : vector<8x128xf32>
    %cst_20 = arith.constant 1.000000e+00 : f32
    %60 = vector.broadcast %cst_20 : f32 to vector<8x128xf32>
    %61 = arith.addf %60, %59 : vector<8x128xf32>
    %62 = arith.divf %60, %61 : vector<8x128xf32>
    %63 = vector.extract_strided_slice %53 {offsets = [0, 128], sizes = [8, 128], strides = [1, 1]} : vector<8x384xbf16> to vector<8x128xbf16>
    %64 = vector.extract_strided_slice %49 {offsets = [0, 128], sizes = [8, 128], strides = [1, 1]} : vector<8x256xf32> to vector<8x128xf32>
    %65 = arith.extf %63 : vector<8x128xbf16> to vector<8x128xf32>
    %66 = arith.addf %65, %64 : vector<8x128xf32>
    %67 = arith.negf %66 : vector<8x128xf32>
    %68 = math.exp %67 : vector<8x128xf32>
    %cst_21 = arith.constant 1.000000e+00 : f32
    %69 = vector.broadcast %cst_21 : f32 to vector<8x128xf32>
    %70 = arith.addf %69, %68 : vector<8x128xf32>
    %71 = arith.divf %69, %70 : vector<8x128xf32>
    %72 = vector.extract_strided_slice %53 {offsets = [0, 256], sizes = [8, 128], strides = [1, 1]} : vector<8x384xbf16> to vector<8x128xbf16>
    %73 = vector.broadcast %5 : vector<1x128xf32> to vector<8x128xf32>
    %74 = arith.addf %50, %73 : vector<8x128xf32>
    %75 = arith.mulf %62, %74 : vector<8x128xf32>
    %76 = arith.extf %72 : vector<8x128xbf16> to vector<8x128xf32>
    %77 = arith.addf %76, %75 : vector<8x128xf32>
    %78 = math.tanh %77 : vector<8x128xf32>
    %79 = arith.addi %6, %c1_i32 : i32
    %80 = arith.index_cast %79 : i32 to index
    %c0_22 = arith.constant 0 : index
    %c0_23 = arith.constant 0 : index
    %81 = vector.load %arg3[%80, %c0_22, %c0_23] : memref<8x8x1xf32, #tpu.memory_space<vmem>>, vector<1x8x1xf32>
    %82 = vector.shape_cast %81 : vector<1x8x1xf32> to vector<8x1xf32>
    %83 = vector.broadcast %82 : vector<8x1xf32> to vector<8x128xf32>
    %84 = arith.mulf %83, %71 : vector<8x128xf32>
    %85 = arith.subf %47, %78 : vector<8x128xf32>
    %86 = arith.mulf %84, %85 : vector<8x128xf32>
    %87 = arith.subf %47, %86 : vector<8x128xf32>
    %c2_i32 = arith.constant 2 : i32
    %88 = arith.truncf %87 : vector<8x128xf32> to vector<8x128xbf16>
    %cst_24 = arith.constant dense<0.000000e+00> : vector<8x256xf32>
    %89 = tpu.matmul %88, %3, %cst_24 {dimension_numbers = #tpu.dot_dimension_numbers<[1], [0], [0], [1], [0, 0, 1, 1], [], []>} : vector<8x128xbf16>, vector<128x256xbf16>, vector<8x256xf32> -> vector<8x256xf32>
    %cst_25 = arith.constant dense<0.000000e+00> : vector<8x128xf32>
    %90 = tpu.matmul %88, %4, %cst_25 {dimension_numbers = #tpu.dot_dimension_numbers<[1], [0], [0], [1], [0, 0, 1, 1], [], []>} : vector<8x128xbf16>, vector<128x128xbf16>, vector<8x128xf32> -> vector<8x128xf32>
    %91 = arith.index_cast %c2_i32 : i32 to index
    %c0_26 = arith.constant 0 : index
    %c0_27 = arith.constant 0 : index
    %92 = vector.load %arg2[%91, %c0_26, %c0_27] : memref<8x8x384xbf16, #tpu.memory_space<vmem>>, vector<1x8x384xbf16>
    %93 = vector.shape_cast %92 : vector<1x8x384xbf16> to vector<8x384xbf16>
    %94 = vector.extract_strided_slice %93 {offsets = [0, 0], sizes = [8, 128], strides = [1, 1]} : vector<8x384xbf16> to vector<8x128xbf16>
    %95 = vector.extract_strided_slice %89 {offsets = [0, 0], sizes = [8, 128], strides = [1, 1]} : vector<8x256xf32> to vector<8x128xf32>
    %96 = arith.extf %94 : vector<8x128xbf16> to vector<8x128xf32>
    %97 = arith.addf %96, %95 : vector<8x128xf32>
    %98 = arith.negf %97 : vector<8x128xf32>
    %99 = math.exp %98 : vector<8x128xf32>
    %cst_28 = arith.constant 1.000000e+00 : f32
    %100 = vector.broadcast %cst_28 : f32 to vector<8x128xf32>
    %101 = arith.addf %100, %99 : vector<8x128xf32>
    %102 = arith.divf %100, %101 : vector<8x128xf32>
    %103 = vector.extract_strided_slice %93 {offsets = [0, 128], sizes = [8, 128], strides = [1, 1]} : vector<8x384xbf16> to vector<8x128xbf16>
    %104 = vector.extract_strided_slice %89 {offsets = [0, 128], sizes = [8, 128], strides = [1, 1]} : vector<8x256xf32> to vector<8x128xf32>
    %105 = arith.extf %103 : vector<8x128xbf16> to vector<8x128xf32>
    %106 = arith.addf %105, %104 : vector<8x128xf32>
    %107 = arith.negf %106 : vector<8x128xf32>
    %108 = math.exp %107 : vector<8x128xf32>
    %cst_29 = arith.constant 1.000000e+00 : f32
    %109 = vector.broadcast %cst_29 : f32 to vector<8x128xf32>
    %110 = arith.addf %109, %108 : vector<8x128xf32>
    %111 = arith.divf %109, %110 : vector<8x128xf32>
    %112 = vector.extract_strided_slice %93 {offsets = [0, 256], sizes = [8, 128], strides = [1, 1]} : vector<8x384xbf16> to vector<8x128xbf16>
    %113 = vector.broadcast %5 : vector<1x128xf32> to vector<8x128xf32>
    %114 = arith.addf %90, %113 : vector<8x128xf32>
    %115 = arith.mulf %102, %114 : vector<8x128xf32>
    %116 = arith.extf %112 : vector<8x128xbf16> to vector<8x128xf32>
    %117 = arith.addf %116, %115 : vector<8x128xf32>
    %118 = math.tanh %117 : vector<8x128xf32>
    %119 = arith.addi %6, %c2_i32 : i32
    %120 = arith.index_cast %119 : i32 to index
    %c0_30 = arith.constant 0 : index
    %c0_31 = arith.constant 0 : index
    %121 = vector.load %arg3[%120, %c0_30, %c0_31] : memref<8x8x1xf32, #tpu.memory_space<vmem>>, vector<1x8x1xf32>
    %122 = vector.shape_cast %121 : vector<1x8x1xf32> to vector<8x1xf32>
    %123 = vector.broadcast %122 : vector<8x1xf32> to vector<8x128xf32>
    %124 = arith.mulf %123, %111 : vector<8x128xf32>
    %125 = arith.subf %87, %118 : vector<8x128xf32>
    %126 = arith.mulf %124, %125 : vector<8x128xf32>
    %127 = arith.subf %87, %126 : vector<8x128xf32>
    %c3_i32 = arith.constant 3 : i32
    %128 = arith.truncf %127 : vector<8x128xf32> to vector<8x128xbf16>
    %cst_32 = arith.constant dense<0.000000e+00> : vector<8x256xf32>
    %129 = tpu.matmul %128, %3, %cst_32 {dimension_numbers = #tpu.dot_dimension_numbers<[1], [0], [0], [1], [0, 0, 1, 1], [], []>} : vector<8x128xbf16>, vector<128x256xbf16>, vector<8x256xf32> -> vector<8x256xf32>
    %cst_33 = arith.constant dense<0.000000e+00> : vector<8x128xf32>
    %130 = tpu.matmul %128, %4, %cst_33 {dimension_numbers = #tpu.dot_dimension_numbers<[1], [0], [0], [1], [0, 0, 1, 1], [], []>} : vector<8x128xbf16>, vector<128x128xbf16>, vector<8x128xf32> -> vector<8x128xf32>
    %131 = arith.index_cast %c3_i32 : i32 to index
    %c0_34 = arith.constant 0 : index
    %c0_35 = arith.constant 0 : index
    %132 = vector.load %arg2[%131, %c0_34, %c0_35] : memref<8x8x384xbf16, #tpu.memory_space<vmem>>, vector<1x8x384xbf16>
    %133 = vector.shape_cast %132 : vector<1x8x384xbf16> to vector<8x384xbf16>
    %134 = vector.extract_strided_slice %133 {offsets = [0, 0], sizes = [8, 128], strides = [1, 1]} : vector<8x384xbf16> to vector<8x128xbf16>
    %135 = vector.extract_strided_slice %129 {offsets = [0, 0], sizes = [8, 128], strides = [1, 1]} : vector<8x256xf32> to vector<8x128xf32>
    %136 = arith.extf %134 : vector<8x128xbf16> to vector<8x128xf32>
    %137 = arith.addf %136, %135 : vector<8x128xf32>
    %138 = arith.negf %137 : vector<8x128xf32>
    %139 = math.exp %138 : vector<8x128xf32>
    %cst_36 = arith.constant 1.000000e+00 : f32
    %140 = vector.broadcast %cst_36 : f32 to vector<8x128xf32>
    %141 = arith.addf %140, %139 : vector<8x128xf32>
    %142 = arith.divf %140, %141 : vector<8x128xf32>
    %143 = vector.extract_strided_slice %133 {offsets = [0, 128], sizes = [8, 128], strides = [1, 1]} : vector<8x384xbf16> to vector<8x128xbf16>
    %144 = vector.extract_strided_slice %129 {offsets = [0, 128], sizes = [8, 128], strides = [1, 1]} : vector<8x256xf32> to vector<8x128xf32>
    %145 = arith.extf %143 : vector<8x128xbf16> to vector<8x128xf32>
    %146 = arith.addf %145, %144 : vector<8x128xf32>
    %147 = arith.negf %146 : vector<8x128xf32>
    %148 = math.exp %147 : vector<8x128xf32>
    %cst_37 = arith.constant 1.000000e+00 : f32
    %149 = vector.broadcast %cst_37 : f32 to vector<8x128xf32>
    %150 = arith.addf %149, %148 : vector<8x128xf32>
    %151 = arith.divf %149, %150 : vector<8x128xf32>
    %152 = vector.extract_strided_slice %133 {offsets = [0, 256], sizes = [8, 128], strides = [1, 1]} : vector<8x384xbf16> to vector<8x128xbf16>
    %153 = vector.broadcast %5 : vector<1x128xf32> to vector<8x128xf32>
    %154 = arith.addf %130, %153 : vector<8x128xf32>
    %155 = arith.mulf %142, %154 : vector<8x128xf32>
    %156 = arith.extf %152 : vector<8x128xbf16> to vector<8x128xf32>
    %157 = arith.addf %156, %155 : vector<8x128xf32>
    %158 = math.tanh %157 : vector<8x128xf32>
    %159 = arith.addi %6, %c3_i32 : i32
    %160 = arith.index_cast %159 : i32 to index
    %c0_38 = arith.constant 0 : index
    %c0_39 = arith.constant 0 : index
    %161 = vector.load %arg3[%160, %c0_38, %c0_39] : memref<8x8x1xf32, #tpu.memory_space<vmem>>, vector<1x8x1xf32>
    %162 = vector.shape_cast %161 : vector<1x8x1xf32> to vector<8x1xf32>
    %163 = vector.broadcast %162 : vector<8x1xf32> to vector<8x128xf32>
    %164 = arith.mulf %163, %151 : vector<8x128xf32>
    %165 = arith.subf %127, %158 : vector<8x128xf32>
    %166 = arith.mulf %164, %165 : vector<8x128xf32>
    %167 = arith.subf %127, %166 : vector<8x128xf32>
    %c4_i32 = arith.constant 4 : i32
    %168 = arith.truncf %167 : vector<8x128xf32> to vector<8x128xbf16>
    %cst_40 = arith.constant dense<0.000000e+00> : vector<8x256xf32>
    %169 = tpu.matmul %168, %3, %cst_40 {dimension_numbers = #tpu.dot_dimension_numbers<[1], [0], [0], [1], [0, 0, 1, 1], [], []>} : vector<8x128xbf16>, vector<128x256xbf16>, vector<8x256xf32> -> vector<8x256xf32>
    %cst_41 = arith.constant dense<0.000000e+00> : vector<8x128xf32>
    %170 = tpu.matmul %168, %4, %cst_41 {dimension_numbers = #tpu.dot_dimension_numbers<[1], [0], [0], [1], [0, 0, 1, 1], [], []>} : vector<8x128xbf16>, vector<128x128xbf16>, vector<8x128xf32> -> vector<8x128xf32>
    %171 = arith.index_cast %c4_i32 : i32 to index
    %c0_42 = arith.constant 0 : index
    %c0_43 = arith.constant 0 : index
    %172 = vector.load %arg2[%171, %c0_42, %c0_43] : memref<8x8x384xbf16, #tpu.memory_space<vmem>>, vector<1x8x384xbf16>
    %173 = vector.shape_cast %172 : vector<1x8x384xbf16> to vector<8x384xbf16>
    %174 = vector.extract_strided_slice %173 {offsets = [0, 0], sizes = [8, 128], strides = [1, 1]} : vector<8x384xbf16> to vector<8x128xbf16>
    %175 = vector.extract_strided_slice %169 {offsets = [0, 0], sizes = [8, 128], strides = [1, 1]} : vector<8x256xf32> to vector<8x128xf32>
    %176 = arith.extf %174 : vector<8x128xbf16> to vector<8x128xf32>
    %177 = arith.addf %176, %175 : vector<8x128xf32>
    %178 = arith.negf %177 : vector<8x128xf32>
    %179 = math.exp %178 : vector<8x128xf32>
    %cst_44 = arith.constant 1.000000e+00 : f32
    %180 = vector.broadcast %cst_44 : f32 to vector<8x128xf32>
    %181 = arith.addf %180, %179 : vector<8x128xf32>
    %182 = arith.divf %180, %181 : vector<8x128xf32>
    %183 = vector.extract_strided_slice %173 {offsets = [0, 128], sizes = [8, 128], strides = [1, 1]} : vector<8x384xbf16> to vector<8x128xbf16>
    %184 = vector.extract_strided_slice %169 {offsets = [0, 128], sizes = [8, 128], strides = [1, 1]} : vector<8x256xf32> to vector<8x128xf32>
    %185 = arith.extf %183 : vector<8x128xbf16> to vector<8x128xf32>
    %186 = arith.addf %185, %184 : vector<8x128xf32>
    %187 = arith.negf %186 : vector<8x128xf32>
    %188 = math.exp %187 : vector<8x128xf32>
    %cst_45 = arith.constant 1.000000e+00 : f32
    %189 = vector.broadcast %cst_45 : f32 to vector<8x128xf32>
    %190 = arith.addf %189, %188 : vector<8x128xf32>
    %191 = arith.divf %189, %190 : vector<8x128xf32>
    %192 = vector.extract_strided_slice %173 {offsets = [0, 256], sizes = [8, 128], strides = [1, 1]} : vector<8x384xbf16> to vector<8x128xbf16>
    %193 = vector.broadcast %5 : vector<1x128xf32> to vector<8x128xf32>
    %194 = arith.addf %170, %193 : vector<8x128xf32>
    %195 = arith.mulf %182, %194 : vector<8x128xf32>
    %196 = arith.extf %192 : vector<8x128xbf16> to vector<8x128xf32>
    %197 = arith.addf %196, %195 : vector<8x128xf32>
    %198 = math.tanh %197 : vector<8x128xf32>
    %199 = arith.addi %6, %c4_i32 : i32
    %200 = arith.index_cast %199 : i32 to index
    %c0_46 = arith.constant 0 : index
    %c0_47 = arith.constant 0 : index
    %201 = vector.load %arg3[%200, %c0_46, %c0_47] : memref<8x8x1xf32, #tpu.memory_space<vmem>>, vector<1x8x1xf32>
    %202 = vector.shape_cast %201 : vector<1x8x1xf32> to vector<8x1xf32>
    %203 = vector.broadcast %202 : vector<8x1xf32> to vector<8x128xf32>
    %204 = arith.mulf %203, %191 : vector<8x128xf32>
    %205 = arith.subf %167, %198 : vector<8x128xf32>
    %206 = arith.mulf %204, %205 : vector<8x128xf32>
    %207 = arith.subf %167, %206 : vector<8x128xf32>
    %c5_i32 = arith.constant 5 : i32
    %208 = arith.truncf %207 : vector<8x128xf32> to vector<8x128xbf16>
    %cst_48 = arith.constant dense<0.000000e+00> : vector<8x256xf32>
    %209 = tpu.matmul %208, %3, %cst_48 {dimension_numbers = #tpu.dot_dimension_numbers<[1], [0], [0], [1], [0, 0, 1, 1], [], []>} : vector<8x128xbf16>, vector<128x256xbf16>, vector<8x256xf32> -> vector<8x256xf32>
    %cst_49 = arith.constant dense<0.000000e+00> : vector<8x128xf32>
    %210 = tpu.matmul %208, %4, %cst_49 {dimension_numbers = #tpu.dot_dimension_numbers<[1], [0], [0], [1], [0, 0, 1, 1], [], []>} : vector<8x128xbf16>, vector<128x128xbf16>, vector<8x128xf32> -> vector<8x128xf32>
    %211 = arith.index_cast %c5_i32 : i32 to index
    %c0_50 = arith.constant 0 : index
    %c0_51 = arith.constant 0 : index
    %212 = vector.load %arg2[%211, %c0_50, %c0_51] : memref<8x8x384xbf16, #tpu.memory_space<vmem>>, vector<1x8x384xbf16>
    %213 = vector.shape_cast %212 : vector<1x8x384xbf16> to vector<8x384xbf16>
    %214 = vector.extract_strided_slice %213 {offsets = [0, 0], sizes = [8, 128], strides = [1, 1]} : vector<8x384xbf16> to vector<8x128xbf16>
    %215 = vector.extract_strided_slice %209 {offsets = [0, 0], sizes = [8, 128], strides = [1, 1]} : vector<8x256xf32> to vector<8x128xf32>
    %216 = arith.extf %214 : vector<8x128xbf16> to vector<8x128xf32>
    %217 = arith.addf %216, %215 : vector<8x128xf32>
    %218 = arith.negf %217 : vector<8x128xf32>
    %219 = math.exp %218 : vector<8x128xf32>
    %cst_52 = arith.constant 1.000000e+00 : f32
    %220 = vector.broadcast %cst_52 : f32 to vector<8x128xf32>
    %221 = arith.addf %220, %219 : vector<8x128xf32>
    %222 = arith.divf %220, %221 : vector<8x128xf32>
    %223 = vector.extract_strided_slice %213 {offsets = [0, 128], sizes = [8, 128], strides = [1, 1]} : vector<8x384xbf16> to vector<8x128xbf16>
    %224 = vector.extract_strided_slice %209 {offsets = [0, 128], sizes = [8, 128], strides = [1, 1]} : vector<8x256xf32> to vector<8x128xf32>
    %225 = arith.extf %223 : vector<8x128xbf16> to vector<8x128xf32>
    %226 = arith.addf %225, %224 : vector<8x128xf32>
    %227 = arith.negf %226 : vector<8x128xf32>
    %228 = math.exp %227 : vector<8x128xf32>
    %cst_53 = arith.constant 1.000000e+00 : f32
    %229 = vector.broadcast %cst_53 : f32 to vector<8x128xf32>
    %230 = arith.addf %229, %228 : vector<8x128xf32>
    %231 = arith.divf %229, %230 : vector<8x128xf32>
    %232 = vector.extract_strided_slice %213 {offsets = [0, 256], sizes = [8, 128], strides = [1, 1]} : vector<8x384xbf16> to vector<8x128xbf16>
    %233 = vector.broadcast %5 : vector<1x128xf32> to vector<8x128xf32>
    %234 = arith.addf %210, %233 : vector<8x128xf32>
    %235 = arith.mulf %222, %234 : vector<8x128xf32>
    %236 = arith.extf %232 : vector<8x128xbf16> to vector<8x128xf32>
    %237 = arith.addf %236, %235 : vector<8x128xf32>
    %238 = math.tanh %237 : vector<8x128xf32>
    %239 = arith.addi %6, %c5_i32 : i32
    %240 = arith.index_cast %239 : i32 to index
    %c0_54 = arith.constant 0 : index
    %c0_55 = arith.constant 0 : index
    %241 = vector.load %arg3[%240, %c0_54, %c0_55] : memref<8x8x1xf32, #tpu.memory_space<vmem>>, vector<1x8x1xf32>
    %242 = vector.shape_cast %241 : vector<1x8x1xf32> to vector<8x1xf32>
    %243 = vector.broadcast %242 : vector<8x1xf32> to vector<8x128xf32>
    %244 = arith.mulf %243, %231 : vector<8x128xf32>
    %245 = arith.subf %207, %238 : vector<8x128xf32>
    %246 = arith.mulf %244, %245 : vector<8x128xf32>
    %247 = arith.subf %207, %246 : vector<8x128xf32>
    %c6_i32 = arith.constant 6 : i32
    %248 = arith.truncf %247 : vector<8x128xf32> to vector<8x128xbf16>
    %cst_56 = arith.constant dense<0.000000e+00> : vector<8x256xf32>
    %249 = tpu.matmul %248, %3, %cst_56 {dimension_numbers = #tpu.dot_dimension_numbers<[1], [0], [0], [1], [0, 0, 1, 1], [], []>} : vector<8x128xbf16>, vector<128x256xbf16>, vector<8x256xf32> -> vector<8x256xf32>
    %cst_57 = arith.constant dense<0.000000e+00> : vector<8x128xf32>
    %250 = tpu.matmul %248, %4, %cst_57 {dimension_numbers = #tpu.dot_dimension_numbers<[1], [0], [0], [1], [0, 0, 1, 1], [], []>} : vector<8x128xbf16>, vector<128x128xbf16>, vector<8x128xf32> -> vector<8x128xf32>
    %251 = arith.index_cast %c6_i32 : i32 to index
    %c0_58 = arith.constant 0 : index
    %c0_59 = arith.constant 0 : index
    %252 = vector.load %arg2[%251, %c0_58, %c0_59] : memref<8x8x384xbf16, #tpu.memory_space<vmem>>, vector<1x8x384xbf16>
    %253 = vector.shape_cast %252 : vector<1x8x384xbf16> to vector<8x384xbf16>
    %254 = vector.extract_strided_slice %253 {offsets = [0, 0], sizes = [8, 128], strides = [1, 1]} : vector<8x384xbf16> to vector<8x128xbf16>
    %255 = vector.extract_strided_slice %249 {offsets = [0, 0], sizes = [8, 128], strides = [1, 1]} : vector<8x256xf32> to vector<8x128xf32>
    %256 = arith.extf %254 : vector<8x128xbf16> to vector<8x128xf32>
    %257 = arith.addf %256, %255 : vector<8x128xf32>
    %258 = arith.negf %257 : vector<8x128xf32>
    %259 = math.exp %258 : vector<8x128xf32>
    %cst_60 = arith.constant 1.000000e+00 : f32
    %260 = vector.broadcast %cst_60 : f32 to vector<8x128xf32>
    %261 = arith.addf %260, %259 : vector<8x128xf32>
    %262 = arith.divf %260, %261 : vector<8x128xf32>
    %263 = vector.extract_strided_slice %253 {offsets = [0, 128], sizes = [8, 128], strides = [1, 1]} : vector<8x384xbf16> to vector<8x128xbf16>
    %264 = vector.extract_strided_slice %249 {offsets = [0, 128], sizes = [8, 128], strides = [1, 1]} : vector<8x256xf32> to vector<8x128xf32>
    %265 = arith.extf %263 : vector<8x128xbf16> to vector<8x128xf32>
    %266 = arith.addf %265, %264 : vector<8x128xf32>
    %267 = arith.negf %266 : vector<8x128xf32>
    %268 = math.exp %267 : vector<8x128xf32>
    %cst_61 = arith.constant 1.000000e+00 : f32
    %269 = vector.broadcast %cst_61 : f32 to vector<8x128xf32>
    %270 = arith.addf %269, %268 : vector<8x128xf32>
    %271 = arith.divf %269, %270 : vector<8x128xf32>
    %272 = vector.extract_strided_slice %253 {offsets = [0, 256], sizes = [8, 128], strides = [1, 1]} : vector<8x384xbf16> to vector<8x128xbf16>
    %273 = vector.broadcast %5 : vector<1x128xf32> to vector<8x128xf32>
    %274 = arith.addf %250, %273 : vector<8x128xf32>
    %275 = arith.mulf %262, %274 : vector<8x128xf32>
    %276 = arith.extf %272 : vector<8x128xbf16> to vector<8x128xf32>
    %277 = arith.addf %276, %275 : vector<8x128xf32>
    %278 = math.tanh %277 : vector<8x128xf32>
    %279 = arith.addi %6, %c6_i32 : i32
    %280 = arith.index_cast %279 : i32 to index
    %c0_62 = arith.constant 0 : index
    %c0_63 = arith.constant 0 : index
    %281 = vector.load %arg3[%280, %c0_62, %c0_63] : memref<8x8x1xf32, #tpu.memory_space<vmem>>, vector<1x8x1xf32>
    %282 = vector.shape_cast %281 : vector<1x8x1xf32> to vector<8x1xf32>
    %283 = vector.broadcast %282 : vector<8x1xf32> to vector<8x128xf32>
    %284 = arith.mulf %283, %271 : vector<8x128xf32>
    %285 = arith.subf %247, %278 : vector<8x128xf32>
    %286 = arith.mulf %284, %285 : vector<8x128xf32>
    %287 = arith.subf %247, %286 : vector<8x128xf32>
    %c7_i32 = arith.constant 7 : i32
    %288 = arith.truncf %287 : vector<8x128xf32> to vector<8x128xbf16>
    %cst_64 = arith.constant dense<0.000000e+00> : vector<8x256xf32>
    %289 = tpu.matmul %288, %3, %cst_64 {dimension_numbers = #tpu.dot_dimension_numbers<[1], [0], [0], [1], [0, 0, 1, 1], [], []>} : vector<8x128xbf16>, vector<128x256xbf16>, vector<8x256xf32> -> vector<8x256xf32>
    %cst_65 = arith.constant dense<0.000000e+00> : vector<8x128xf32>
    %290 = tpu.matmul %288, %4, %cst_65 {dimension_numbers = #tpu.dot_dimension_numbers<[1], [0], [0], [1], [0, 0, 1, 1], [], []>} : vector<8x128xbf16>, vector<128x128xbf16>, vector<8x128xf32> -> vector<8x128xf32>
    %291 = arith.index_cast %c7_i32 : i32 to index
    %c0_66 = arith.constant 0 : index
    %c0_67 = arith.constant 0 : index
    %292 = vector.load %arg2[%291, %c0_66, %c0_67] : memref<8x8x384xbf16, #tpu.memory_space<vmem>>, vector<1x8x384xbf16>
    %293 = vector.shape_cast %292 : vector<1x8x384xbf16> to vector<8x384xbf16>
    %294 = vector.extract_strided_slice %293 {offsets = [0, 0], sizes = [8, 128], strides = [1, 1]} : vector<8x384xbf16> to vector<8x128xbf16>
    %295 = vector.extract_strided_slice %289 {offsets = [0, 0], sizes = [8, 128], strides = [1, 1]} : vector<8x256xf32> to vector<8x128xf32>
    %296 = arith.extf %294 : vector<8x128xbf16> to vector<8x128xf32>
    %297 = arith.addf %296, %295 : vector<8x128xf32>
    %298 = arith.negf %297 : vector<8x128xf32>
    %299 = math.exp %298 : vector<8x128xf32>
    %cst_68 = arith.constant 1.000000e+00 : f32
    %300 = vector.broadcast %cst_68 : f32 to vector<8x128xf32>
    %301 = arith.addf %300, %299 : vector<8x128xf32>
    %302 = arith.divf %300, %301 : vector<8x128xf32>
    %303 = vector.extract_strided_slice %293 {offsets = [0, 128], sizes = [8, 128], strides = [1, 1]} : vector<8x384xbf16> to vector<8x128xbf16>
    %304 = vector.extract_strided_slice %289 {offsets = [0, 128], sizes = [8, 128], strides = [1, 1]} : vector<8x256xf32> to vector<8x128xf32>
    %305 = arith.extf %303 : vector<8x128xbf16> to vector<8x128xf32>
    %306 = arith.addf %305, %304 : vector<8x128xf32>
    %307 = arith.negf %306 : vector<8x128xf32>
    %308 = math.exp %307 : vector<8x128xf32>
    %cst_69 = arith.constant 1.000000e+00 : f32
    %309 = vector.broadcast %cst_69 : f32 to vector<8x128xf32>
    %310 = arith.addf %309, %308 : vector<8x128xf32>
    %311 = arith.divf %309, %310 : vector<8x128xf32>
    %312 = vector.extract_strided_slice %293 {offsets = [0, 256], sizes = [8, 128], strides = [1, 1]} : vector<8x384xbf16> to vector<8x128xbf16>
    %313 = vector.broadcast %5 : vector<1x128xf32> to vector<8x128xf32>
    %314 = arith.addf %290, %313 : vector<8x128xf32>
    %315 = arith.mulf %302, %314 : vector<8x128xf32>
    %316 = arith.extf %312 : vector<8x128xbf16> to vector<8x128xf32>
    %317 = arith.addf %316, %315 : vector<8x128xf32>
    %318 = math.tanh %317 : vector<8x128xf32>
    %319 = arith.addi %6, %c7_i32 : i32
    %320 = arith.index_cast %319 : i32 to index
    %c0_70 = arith.constant 0 : index
    %c0_71 = arith.constant 0 : index
    %321 = vector.load %arg3[%320, %c0_70, %c0_71] : memref<8x8x1xf32, #tpu.memory_space<vmem>>, vector<1x8x1xf32>
    %322 = vector.shape_cast %321 : vector<1x8x1xf32> to vector<8x1xf32>
    %323 = vector.broadcast %322 : vector<8x1xf32> to vector<8x128xf32>
    %324 = arith.mulf %323, %311 : vector<8x128xf32>
    %325 = arith.subf %287, %318 : vector<8x128xf32>
    %326 = arith.mulf %324, %325 : vector<8x128xf32>
    %327 = arith.subf %287, %326 : vector<8x128xf32>
    %c8_i32_72 = arith.constant 8 : i32
    %c0_73 = arith.constant 0 : index
    %c0_74 = arith.constant 0 : index
    %328 = vector.load %arg8[%c0_73, %c0_74] : memref<8x128xf32, #tpu.memory_space<vmem>>, vector<8x128xf32>
    tpu.vector_store %arg8[%c0_73, %c0_74], %327 {strides = array<i32>} : memref<8x128xf32, #tpu.memory_space<vmem>>, vector<8x128xf32>,
    return
  }
  func.func @transform_0(%arg0: i32, %arg1: i32) -> (i32, i32, i32) {
    %c0_i32 = arith.constant 0 : i32
    %c0_i32_0 = arith.constant 0 : i32
    return %arg1, %arg0, %c0_i32 : i32, i32, i32
  }
  func.func @transform_1(%arg0: i32, %arg1: i32) -> (i32, i32, i32) {
    %c0_i32 = arith.constant 0 : i32
    %c0_i32_0 = arith.constant 0 : i32
    %c0_i32_1 = arith.constant 0 : i32
    return %c0_i32, %arg0, %c0_i32_0 : i32, i32, i32
  }
  func.func @transform_2(%arg0: i32, %arg1: i32) -> (i32, i32) {
    %c0_i32 = arith.constant 0 : i32
    %c0_i32_0 = arith.constant 0 : i32
    return %arg0, %c0_i32 : i32, i32
  }
  func.func @transform_3(%arg0: i32, %arg1: i32) -> (i32, i32) {
    %c0_i32 = arith.constant 0 : i32
    %c0_i32_0 = arith.constant 0 : i32
    %c0_i32_1 = arith.constant 0 : i32
    return %c0_i32, %c0_i32_0 : i32, i32
  }
  func.func @transform_4(%arg0: i32, %arg1: i32) -> (i32, i32) {
    %c0_i32 = arith.constant 0 : i32
    %c0_i32_0 = arith.constant 0 : i32
    %c0_i32_1 = arith.constant 0 : i32
    return %c0_i32, %c0_i32_0 : i32, i32
  }
  func.func @transform_5(%arg0: i32, %arg1: i32) -> (i32, i32) {
    %c0_i32 = arith.constant 0 : i32
    %c0_i32_0 = arith.constant 0 : i32
    %c0_i32_1 = arith.constant 0 : i32
    return %c0_i32, %c0_i32_0 : i32, i32
  }
  func.func @transform_6(%arg0: i32, %arg1: i32) -> (i32, i32) {
    %c0_i32 = arith.constant 0 : i32
    %c0_i32_0 = arith.constant 0 : i32
    return %arg0, %c0_i32 : i32, i32
  }
}

</mosaic_0001>

<bundles_post_ra>
// kernel: psru_forward.1
= control target key start
LH: loop header
LB: loop body
LE: loop exit
PB: predicated region body
PF: predicated region fallthrough
CT: control target
= control target key end

     0   :  { %v1640_v2 = vmov 0.0   ;;  %v1641_v3 = vmov 0   ;;  %vm1642_vm0 = vmmov 0   ;;  %s2250_s0 = inlined_call_operand.vmem [shape: bf16[8,8,384], index: 0, kind: input, shape index: {}]   ;;  %s2251_s1 = inlined_call_operand.vmem [shape: f32[8,8,1], index: 1, kind: input, shape index: {}]   ;;  %s2252_s2 = inlined_call_operand.vmem [shape: f32[8,128], index: 2, kind: input, shape index: {}]   ;;  %s2253_s3 = inlined_call_operand.vmem [shape: bf16[128,256], index: 3, kind: input, shape index: {}]   ;;  %s2254_s4 = inlined_call_operand.vmem [shape: bf16[128,128], index: 4, kind: input, shape index: {}]   ;;  %s2255_s5 = inlined_call_operand.vmem [shape: f32[1,128], index: 5, kind: input, shape index: {}]   ;;  %s2256_s6 = inlined_call_operand.hbm [shape: f32[8,128], index: 6, kind: output, shape index: {}]  }
   0x1   :  { %v1682_v0 = vld [vmem:[%s2253_s3 + $0x74] ss:$8 sps:$4 sm:$0xff]   ;;  %v1687_v1 = vld [vmem:[%s2253_s3 + $0x70] ss:$8 sps:$4 sm:$0xff]   ;;  %1322 = vmatprep.subr.bf16.mxu1 %v1640_v2  ;;  %179 = vmatprep.mubr.bf16.mxu0 %v1641_v3  ;;  %v1695_v4 = vld [vmem:[%s2253_s3 + $0x64] ss:$8 sps:$4 sm:$0xff]  }
   0x2   :  { %147 = vmatprep.subr.bf16.mxu0 %v1682_v0  ;;  %1338 = vmatprep.mubr.msk.bf16.mxu1 %vm1642_vm0, %v1640_v2  ;;  %v1703_v5 = vld [vmem:[%s2253_s3 + $0x60] ss:$8 sps:$4 sm:$0xff]   ;;  %v1710_v6 = vld [vmem:[%s2253_s3 + $0x54] ss:$8 sps:$4 sm:$0xff]   ;;  %v1717_v7 = vld [vmem:[%s2253_s3 + $0x50] ss:$8 sps:$4 sm:$0xff]  }
   0x3   :  { %148 = vmatpush1.bf16.msra.mxu0 %v1687_v1  ;;  %1486 = vset.pattern.permute.xlu0 %v1641_v3  ;;  %v1723_v8 = vld [vmem:[%s2253_s3 + $0x44] ss:$8 sps:$4 sm:$0xff]   ;;  %v1728_v9 = vld [vmem:[%s2254_s4 + $0x38] sm:$0xff]   ;;  %v1734_v10 = vld [vmem:[%s2253_s3 + $0x40] ss:$8 sps:$4 sm:$0xff]  }
   0x4   :  { %149 = vmatprep.subr.bf16.mxu0 %v1695_v4  ;;  %1487 = vset.pattern.permute.xlu1 %v1641_v3  ;;  %v1740_v11 = vld [vmem:[%s2253_s3 + $0x34] ss:$8 sps:$4 sm:$0xff]   ;;  %v1752_v13 = vld [vmem:[%s2253_s3 + $0x30] ss:$8 sps:$4 sm:$0xff]   ;;  %v1758_v14 = vld [vmem:[%s2253_s3 + $0x24] ss:$8 sps:$4 sm:$0xff]  }
   0x5   :  { %1323 = vmatpush3.bf16.msra.mxu1 %v1728_v9  ;;  %v1746_v12 = vld [vmem:[%s2254_s4 + $0x30] sm:$0xff]   ;;  %v1765_v15 = vld [vmem:[%s2254_s4 + $0x28] sm:$0xff]   ;;  %v309_v17 = vld [vmem:[%s2251_s1] sm:$0xff] }
   0x6   :  { %1324 = vmatprep.subr.bf16.mxu1 %v1640_v2  ;;  %v1772_v16 = vld [vmem:[%s2253_s3 + $0x20] ss:$8 sps:$4 sm:$0xff]   ;;  %v1781_v18 = vld [vmem:[%s2253_s3 + $0x14] ss:$8 sps:$4 sm:$0xff]  }
   0x7   :  { %150 = vmatpush1.bf16.msra.mxu0 %v1703_v5  ;;  %v1787_v19 = vld [vmem:[%s2254_s4 + $0x20] sm:$0xff]  }
   0x8   :  { %151 = vmatprep.subr.bf16.mxu0 %v1710_v6 }
   0x9   :  { %1325 = vmatpush3.bf16.msra.mxu1 %v1746_v12 }
   0xa   :  { %1326 = vmatprep.subr.bf16.mxu1 %v1640_v2 }
   0xb   :  { %152 = vmatpush1.bf16.msra.mxu0 %v1717_v7 }
   0xc   :  { %153 = vmatprep.subr.bf16.mxu0 %v1723_v8 }
   0xd   :  { %1327 = vmatpush3.bf16.msra.mxu1 %v1765_v15 }
   0xf   :  { %154 = vmatpush1.bf16.msra.mxu0 %v1734_v10 }
  0x10   :  { %155 = vmatprep.subr.bf16.mxu0 %v1740_v11 }
  0x13   :  { %156 = vmatpush1.bf16.msra.mxu0 %v1752_v13 }
  0x14   :  { %157 = vmatprep.subr.bf16.mxu0 %v1758_v14 }
  0x15   :  { %11 = vsyncpa [#allocation3], 0  ;;  %1328 = vmatprep.subr.bf16.mxu1 %v1640_v2  ;;  %312 = vperm.xlu0 %1486, %v309_v17   ;;  %v1219_v20 = vld [vmem:[%s2251_s1 + $0x8] sm:$0xff]  ;;  %v1797_v21 = vld [vmem:[%s2253_s3 + $0x10] ss:$8 sps:$4 sm:$0xff]  }
  0x16   :  { %v1803_v22 = vld [vmem:[%s2253_s3 + $0x4] ss:$8 sps:$4 sm:$0xff]   ;;  %1329 = vmatpush3.bf16.msra.mxu1 %v1787_v19  ;;  %v1809_v23 = vld [vmem:[%s2254_s4 + $0x18] sm:$0xff]   ;;  %v1819_v25 = vld [vmem:[%s2253_s3] ss:$8 sps:$4 sm:$0xff]  }
  0x17   :  { %158 = vmatpush1.bf16.msra.mxu0 %v1772_v16  ;;  %1330 = vmatprep.subr.bf16.mxu1 %v1640_v2  ;;  %v1234_v24 = vld [vmem:[%s2251_s1 + $0x20] sm:$0xff]  ;;  %v1831_v27 = vld [vmem:[%s2254_s4 + $0x10] sm:$0xff]   ;;  %v1844_v30 = vld [vmem:[%s2254_s4 + $0x8] sm:$0xff]  }
  0x18   :  { %159 = vmatprep.subr.bf16.mxu0 %v1781_v18  ;;  %v1824_v26 = vld [vmem:[%s2252_s2] sm:$0xff]  ;;  %v1244_v29 = vld [vmem:[%s2251_s1 + $0x30] sm:$0xff] }
  0x19   :  { %433 = vperm.xlu0 %1486, %v1219_v20   ;;  %v66_v28 = vpack.c.bf16 %v1824_v26, %v1824_v26  ;;  %v1854_v31 = vld [vmem:[%s2254_s4] sm:$0xff]   ;;  %v1903_v52 = vld [vmem:[%s2250_s0 + $0x8] ss:$12 sps:$4 sm:$0xff]  }
  0x1a   :  { %1331 = vmatpush3.bf16.msra.mxu1 %v1809_v23  ;;  %v188_v32 = vld [vmem:[%s2250_s0] sm:$0xff]  ;;  %v304_v55 = vunpack.c.l.bf16 %v1903_v52 }
  0x1b   :  { %160 = vmatpush1.bf16.msra.mxu0 %v1797_v21  ;;  %1332 = vmatprep.subr.bf16.mxu1 %v1640_v2  ;;  %v190_v33 = vunpack.c.l.bf16 %v188_v32  ;;  %v199_v36 = vrot.slane %v188_v32, 4  ;;  %v1898_v50 = vld [vmem:[%s2255_s5] ss:$0 sm:$0xff]  ;;  %v1249_v32 = vld [vmem:[%s2251_s1 + $0x38] sm:$0xff] }
  0x1c   :  { %161 = vmatprep.subr.bf16.mxu0 %v1803_v22 }
  0x1d   :  { %796 = vperm.xlu0 %1486, %v1234_v24   ;;  %v201_v40 = vunpack.c.l.bf16 %v199_v36 }
  0x1e   :  { %1333 = vmatpush3.bf16.msra.mxu1 %v1831_v27 }
  0x1f   :  { %162 = vmatpush1.bf16.msra.mxu0 %v1819_v25  ;;  %1334 = vmatprep.subr.bf16.mxu1 %v1640_v2 }
  0x20   :  { %320 = vmatprep.subr.bf16.mxu0 %v1682_v0 }
  0x21   :  { %1038 = vperm.xlu0 %1486, %v1244_v29   ;;  %v1239_v29 = vld [vmem:[%s2251_s1 + $0x28] sm:$0xff] }
  0x22   :  { %180 = vmatmul.mubr.bf16.vlgmr.msra.gmra.mxu0 %v66_v28  ;;  %1335 = vmatpush3.bf16.msra.mxu1 %v1844_v30 }
  0x23   :  { %321 = vmatpush1.bf16.msra.mxu0 %v1687_v1  ;;  %352 = vmatprep.mubr.bf16.mxu0 %v1641_v3 }
  0x24   :  { %322 = vmatprep.subr.bf16.mxu0 %v1695_v4  ;;  %1336 = vmatprep.subr.bf16.mxu1 %v1640_v2 }
  0x26   :  { %1337 = vmatpush3.bf16.msra.mxu1 %v1854_v31 }
  0x27   :  { %323 = vmatpush1.bf16.msra.mxu0 %v1703_v5  ;;  %1342 = vmatprep.subr.bf16.mxu1 %v1640_v2 }
  0x28   :  { %324 = vmatprep.subr.bf16.mxu0 %v1710_v6 }
  0x29   :  { %1339 = vmatmul.mubr.bf16.vlgmr.msra.gmra.mxu1 %v66_v28  ;;  %v1229_v28 = vld [vmem:[%s2251_s1 + $0x18] sm:$0xff] }
  0x2a   :  { %1343 = vmatpush3.bf16.msra.mxu1 %v1728_v9  ;;  %1358 = vmatprep.mubr.msk.bf16.mxu1 %vm1642_vm0, %v1640_v2 }
  0x2b   :  { %325 = vmatpush1.bf16.msra.mxu0 %v1717_v7  ;;  %1344 = vmatprep.subr.bf16.mxu1 %v1640_v2 }
  0x2c   :  { %326 = vmatprep.subr.bf16.mxu0 %v1723_v8 }
  0x2e   :  { %1345 = vmatpush3.bf16.msra.mxu1 %v1746_v12 }
  0x2f   :  { %327 = vmatpush1.bf16.msra.mxu0 %v1734_v10  ;;  %1346 = vmatprep.subr.bf16.mxu1 %v1640_v2 }
  0x30   :  { %328 = vmatprep.subr.bf16.mxu0 %v1740_v11 }
  0x32   :  { %1347 = vmatpush3.bf16.msra.mxu1 %v1765_v15 }
  0x33   :  { %329 = vmatpush1.bf16.msra.mxu0 %v1752_v13  ;;  %1348 = vmatprep.subr.bf16.mxu1 %v1640_v2 }
  0x34   :  { %330 = vmatprep.subr.bf16.mxu0 %v1758_v14 }
  0x36   :  { %1349 = vmatpush3.bf16.msra.mxu1 %v1787_v19 }
  0x37   :  { %331 = vmatpush1.bf16.msra.mxu0 %v1772_v16  ;;  %1350 = vmatprep.subr.bf16.mxu1 %v1640_v2 }
  0x38   :  { %332 = vmatprep.subr.bf16.mxu0 %v1781_v18 }
  0x3a   :  { %1351 = vmatpush3.bf16.msra.mxu1 %v1809_v23 }
  0x3b   :  { %333 = vmatpush1.bf16.msra.mxu0 %v1797_v21  ;;  %1352 = vmatprep.subr.bf16.mxu1 %v1640_v2 }
  0x3c   :  { %334 = vmatprep.subr.bf16.mxu0 %v1803_v22 }
  0x3e   :  { %1353 = vmatpush3.bf16.msra.mxu1 %v1831_v27 }
  0x3f   :  { %335 = vmatpush1.bf16.msra.mxu0 %v1819_v25  ;;  %1354 = vmatprep.subr.bf16.mxu1 %v1640_v2 }
  0x40   :  { %441 = vmatprep.subr.bf16.mxu0 %v1682_v0 }
  0x42   :  { %1355 = vmatpush3.bf16.msra.mxu1 %v1844_v30 }
  0x43   :  { %1356 = vmatprep.subr.bf16.mxu1 %v1640_v2 }
  0x46   :  { %1357 = vmatpush3.bf16.msra.mxu1 %v1854_v31 }
  0x47   :  { %1362 = vmatprep.subr.bf16.mxu1 %v1640_v2 }
  0x90   :  { %v313_v60 = vpop.permute.xlu0 %312 }
  0xe2   :  { %v181_v34 = vpop.f32.mrf.mxu0 }
  0xe3   :  { %v191_v35 = vadd.f32 %v190_v33, %v181_v34  ;;  %v1215_v33 = vld [vmem:[%s2250_s0 + $0xc] sm:$0xff] }
  0xe4   :  { %v183_v37 = vpop.f32.mrf.mxu0  ;;  %v364_v34 = vunpack.c.l.bf16 %v1215_v33 }
  0xe5   :  { %v1204_v38 = vmul.f32 -1.442695, %v191_v35  ;;  %v202_v42 = vadd.f32 %v201_v40, %v183_v37 }
  0xe6   :  { %v185_v39 = vpop.f32.mrf.mxu0 }
  0xe7   :  { %1520 = vpow2.f32 %v1204_v38  ;;  %v1205_v45 = vmul.f32 -1.442695, %v202_v42  ;;  %v373_v38 = vrot.slane %v1215_v33, 4 }
  0xe8   :  { %v186_v41 = vpop.f32.mrf.mxu0 }
  0xe9   :  { %v297_v43 = vpop.f32.mrf.mxu1  ;;  %1522 = vpow2.f32 %v1205_v45 }
  0xea   :  { %v298_v53 = vadd.f32 %v1898_v50, %v297_v43 }
  0xeb   :  { %v1340_v44 = vpop.f32.mrf.mxu1 }
  0xec   :  { %v375_v44 = vunpack.c.l.bf16 %v373_v38 }
  0xed   :  { %v300_v46 = vpop.f32.mrf.mxu1 }
  0xef   :  { %v1341_v47 = vpop.f32.mrf.mxu1 }
  0xf4   :  { %v1521_v48 = vpop.eup %1520 }
  0xf5   :  { %v195_v49 = vadd.f32 1.0, %v1521_v48 }
  0xf6   :  { %v1523_v51 = vpop.eup %1522 }
  0xf7   :  { %1524 = vrcp.f32 %v195_v49  ;;  %v206_v54 = vadd.f32 1.0, %v1523_v51 }
  0xf9   :  { %1526 = vrcp.f32 %v206_v54 }
 0x104   :  { %v1525_v56 = vpop.eup %1524 }
 0x105   :  { %v303_v57 = vmul.f32 %v1525_v56, %v298_v53 }
 0x106   :  { %v1527_v59 = vpop.eup %1526 }
 0x107   :  { %v305_v58 = vadd.f32 %v304_v55, %v303_v57  ;;  %v315_v62 = vmul.f32 %v1527_v59, %v313_v60  ;;  %v424_v55 = vunpack.c.h.bf16 %v1903_v52  ;;  %v1220_v52 = vld [vmem:[%s2250_s0 + $0x18] sm:$0xff] }
 0x109   :  { %1528 = vtanh.f32 %v305_v58 }
 0x116   :  { %v1529_v61 = vpop.eup %1528 }
 0x117   :  { %v316_v63 = vsub.f32 %v1824_v26, %v1529_v61 }
 0x119   :  { %v317_v17 = vmul.f32 %v316_v63, %v315_v62  ;;  %v434_v62 = vpop.permute.xlu0 %433 }
 0x11b   :  { %v1909_v20 = vsub.f32 %v1824_v26, %v317_v17  ;;  %v1224_v26 = vld [vmem:[%s2251_s1 + $0x10] sm:$0xff] }
 0x11c   :  { %554 = vperm.xlu1 %1487, %v1224_v26  }
 0x11d   :  { %v319_v24 = vpack.c.bf16 %v1909_v20, %v1909_v20 }
 0x11f   :  { %353 = vmatmul.mubr.bf16.vlgmr.msra.gmra.mxu0 %v319_v24  ;;  %1359 = vmatmul.mubr.bf16.vlgmr.msra.gmra.mxu1 %v319_v24 }
 0x120   :  { %442 = vmatpush1.bf16.msra.mxu0 %v1687_v1  ;;  %1363 = vmatpush3.bf16.msra.mxu1 %v1728_v9 }
 0x121   :  { %443 = vmatprep.subr.bf16.mxu0 %v1695_v4  ;;  %1364 = vmatprep.subr.bf16.mxu1 %v1640_v2 }
 0x122   :  { %473 = vmatprep.mubr.bf16.mxu0 %v1641_v3  ;;  %1378 = vmatprep.mubr.msk.bf16.mxu1 %vm1642_vm0, %v1640_v2 }
 0x123   :  { %675 = vperm.xlu1 %1487, %v1229_v28  }
 0x124   :  { %444 = vmatpush1.bf16.msra.mxu0 %v1703_v5  ;;  %1365 = vmatpush3.bf16.msra.mxu1 %v1746_v12 }
 0x125   :  { %445 = vmatprep.subr.bf16.mxu0 %v1710_v6  ;;  %1366 = vmatprep.subr.bf16.mxu1 %v1640_v2 }
 0x127   :  { %917 = vperm.xlu1 %1487, %v1239_v29  }
 0x128   :  { %446 = vmatpush1.bf16.msra.mxu0 %v1717_v7  ;;  %1367 = vmatpush3.bf16.msra.mxu1 %v1765_v15 }
 0x129   :  { %447 = vmatprep.subr.bf16.mxu0 %v1723_v8  ;;  %1368 = vmatprep.subr.bf16.mxu1 %v1640_v2 }
 0x12b   :  { %1159 = vperm.xlu1 %1487, %v1249_v32  }
 0x12c   :  { %448 = vmatpush1.bf16.msra.mxu0 %v1734_v10  ;;  %1369 = vmatpush3.bf16.msra.mxu1 %v1787_v19 }
 0x12d   :  { %449 = vmatprep.subr.bf16.mxu0 %v1740_v11  ;;  %1370 = vmatprep.subr.bf16.mxu1 %v1640_v2 }
 0x130   :  { %450 = vmatpush1.bf16.msra.mxu0 %v1752_v13  ;;  %1371 = vmatpush3.bf16.msra.mxu1 %v1809_v23 }
 0x131   :  { %451 = vmatprep.subr.bf16.mxu0 %v1758_v14  ;;  %1372 = vmatprep.subr.bf16.mxu1 %v1640_v2 }
 0x134   :  { %452 = vmatpush1.bf16.msra.mxu0 %v1772_v16  ;;  %1373 = vmatpush3.bf16.msra.mxu1 %v1831_v27 }
 0x135   :  { %453 = vmatprep.subr.bf16.mxu0 %v1781_v18  ;;  %1374 = vmatprep.subr.bf16.mxu1 %v1640_v2 }
 0x138   :  { %454 = vmatpush1.bf16.msra.mxu0 %v1797_v21  ;;  %1375 = vmatpush3.bf16.msra.mxu1 %v1844_v30 }
 0x139   :  { %455 = vmatprep.subr.bf16.mxu0 %v1803_v22  ;;  %1376 = vmatprep.subr.bf16.mxu1 %v1640_v2 }
 0x13c   :  { %456 = vmatpush1.bf16.msra.mxu0 %v1819_v25  ;;  %1377 = vmatpush3.bf16.msra.mxu1 %v1854_v31 }
 0x13d   :  { %562 = vmatprep.subr.bf16.mxu0 %v1682_v0  ;;  %1382 = vmatprep.subr.bf16.mxu1 %v1640_v2 }
 0x1df   :  { %v354_v35 = vpop.f32.mrf.mxu0  ;;  %v417_v36 = vpop.f32.mrf.mxu1 }
 0x1e0   :  { %v365_v37 = vadd.f32 %v364_v34, %v354_v35  ;;  %v418_v54 = vadd.f32 %v1898_v50, %v417_v36  ;;  %v494_v34 = vrot.slane %v1220_v52, 4 }
 0x1e1   :  { %v356_v39 = vpop.f32.mrf.mxu0  ;;  %v1360_v40 = vpop.f32.mrf.mxu1 }
 0x1e2   :  { %v1217_v41 = vmul.f32 -1.442695, %v365_v37  ;;  %v376_v47 = vadd.f32 %v375_v44, %v356_v39  ;;  %v496_v40 = vunpack.c.l.bf16 %v494_v34 }
 0x1e3   :  { %v358_v42 = vpop.f32.mrf.mxu0  ;;  %v420_v43 = vpop.f32.mrf.mxu1 }
 0x1e4   :  { %1530 = vpow2.f32 %v1217_v41  ;;  %v1218_v48 = vmul.f32 -1.442695, %v376_v47 }
 0x1e5   :  { %v359_v45 = vpop.f32.mrf.mxu0  ;;  %v1361_v46 = vpop.f32.mrf.mxu1 }
 0x1e6   :  { %1532 = vpow2.f32 %v1218_v48  ;;  %v2012_v48 = vld [vmem:[%s2250_s0 + $0x20] ss:$12 sps:$4 sm:$0xff]  }
 0x1f1   :  { %v1531_v49 = vpop.eup %1530 }
 0x1f2   :  { %v369_v51 = vadd.f32 1.0, %v1531_v49 }
 0x1f3   :  { %v1533_v53 = vpop.eup %1532 }
 0x1f4   :  { %1534 = vrcp.f32 %v369_v51  ;;  %v380_v56 = vadd.f32 1.0, %v1533_v53  ;;  %v545_v51 = vunpack.c.l.bf16 %v2012_v48 }
 0x1f6   :  { %1536 = vrcp.f32 %v380_v56 }
 0x201   :  { %v1535_v57 = vpop.eup %1534 }
 0x202   :  { %v423_v58 = vmul.f32 %v1535_v57, %v418_v54 }
 0x203   :  { %v1537_v60 = vpop.eup %1536 }
 0x204   :  { %v425_v59 = vadd.f32 %v424_v55, %v423_v58  ;;  %v436_v63 = vmul.f32 %v1537_v60, %v434_v62  ;;  %v555_v58 = vpop.permute.xlu1 %554 }
 0x206   :  { %1538 = vtanh.f32 %v425_v59 }
 0x213   :  { %v1539_v61 = vpop.eup %1538 }
 0x214   :  { %v437_v17 = vsub.f32 %v1909_v20, %v1539_v61 }
 0x216   :  { %v438_v24 = vmul.f32 %v437_v17, %v436_v63 }
 0x218   :  { %v1967_v26 = vsub.f32 %v1909_v20, %v438_v24  ;;  %v485_v20 = vunpack.c.l.bf16 %v1220_v52  ;;  %v1225_v24 = vld [vmem:[%s2250_s0 + $0x24] sm:$0xff] }
 0x21a   :  { %v440_v28 = vpack.c.bf16 %v1967_v26, %v1967_v26 }
 0x21c   :  { %474 = vmatmul.mubr.bf16.vlgmr.msra.gmra.mxu0 %v440_v28  ;;  %1379 = vmatmul.mubr.bf16.vlgmr.msra.gmra.mxu1 %v440_v28 }
 0x21d   :  { %563 = vmatpush1.bf16.msra.mxu0 %v1687_v1  ;;  %1383 = vmatpush3.bf16.msra.mxu1 %v1728_v9 }
 0x21e   :  { %564 = vmatprep.subr.bf16.mxu0 %v1695_v4  ;;  %1384 = vmatprep.subr.bf16.mxu1 %v1640_v2 }
 0x21f   :  { %594 = vmatprep.mubr.bf16.mxu0 %v1641_v3  ;;  %1398 = vmatprep.mubr.msk.bf16.mxu1 %vm1642_vm0, %v1640_v2 }
 0x221   :  { %565 = vmatpush1.bf16.msra.mxu0 %v1703_v5  ;;  %1385 = vmatpush3.bf16.msra.mxu1 %v1746_v12 }
 0x222   :  { %566 = vmatprep.subr.bf16.mxu0 %v1710_v6  ;;  %1386 = vmatprep.subr.bf16.mxu1 %v1640_v2 }
 0x225   :  { %567 = vmatpush1.bf16.msra.mxu0 %v1717_v7  ;;  %1387 = vmatpush3.bf16.msra.mxu1 %v1765_v15 }
 0x226   :  { %568 = vmatprep.subr.bf16.mxu0 %v1723_v8  ;;  %1388 = vmatprep.subr.bf16.mxu1 %v1640_v2 }
 0x229   :  { %569 = vmatpush1.bf16.msra.mxu0 %v1734_v10  ;;  %1389 = vmatpush3.bf16.msra.mxu1 %v1787_v19 }
 0x22a   :  { %570 = vmatprep.subr.bf16.mxu0 %v1740_v11  ;;  %1390 = vmatprep.subr.bf16.mxu1 %v1640_v2 }
 0x22d   :  { %571 = vmatpush1.bf16.msra.mxu0 %v1752_v13  ;;  %1391 = vmatpush3.bf16.msra.mxu1 %v1809_v23 }
 0x22e   :  { %572 = vmatprep.subr.bf16.mxu0 %v1758_v14  ;;  %1392 = vmatprep.subr.bf16.mxu1 %v1640_v2 }
 0x231   :  { %573 = vmatpush1.bf16.msra.mxu0 %v1772_v16  ;;  %1393 = vmatpush3.bf16.msra.mxu1 %v1831_v27 }
 0x232   :  { %574 = vmatprep.subr.bf16.mxu0 %v1781_v18  ;;  %1394 = vmatprep.subr.bf16.mxu1 %v1640_v2 }
 0x235   :  { %575 = vmatpush1.bf16.msra.mxu0 %v1797_v21  ;;  %1395 = vmatpush3.bf16.msra.mxu1 %v1844_v30 }
 0x236   :  { %576 = vmatprep.subr.bf16.mxu0 %v1803_v22  ;;  %1396 = vmatprep.subr.bf16.mxu1 %v1640_v2 }
 0x239   :  { %577 = vmatpush1.bf16.msra.mxu0 %v1819_v25  ;;  %1397 = vmatpush3.bf16.msra.mxu1 %v1854_v31 }
 0x23a   :  { %683 = vmatprep.subr.bf16.mxu0 %v1682_v0  ;;  %1402 = vmatprep.subr.bf16.mxu1 %v1640_v2 }
 0x2dc   :  { %v475_v29 = vpop.f32.mrf.mxu0  ;;  %v538_v32 = vpop.f32.mrf.mxu1 }
 0x2dd   :  { %v486_v33 = vadd.f32 %v485_v20, %v475_v29  ;;  %v539_v49 = vadd.f32 %v1898_v50, %v538_v32  ;;  %v615_v29 = vrot.slane %v1225_v24, 4 }
 0x2de   :  { %v477_v35 = vpop.f32.mrf.mxu0  ;;  %v1380_v36 = vpop.f32.mrf.mxu1 }
 0x2df   :  { %v1222_v37 = vmul.f32 -1.442695, %v486_v33  ;;  %v497_v43 = vadd.f32 %v496_v40, %v477_v35 }
 0x2e0   :  { %v479_v38 = vpop.f32.mrf.mxu0  ;;  %v541_v39 = vpop.f32.mrf.mxu1 }
 0x2e1   :  { %1540 = vpow2.f32 %v1222_v37  ;;  %v1223_v44 = vmul.f32 -1.442695, %v497_v43  ;;  %v617_v37 = vunpack.c.l.bf16 %v615_v29 }
 0x2e2   :  { %v480_v41 = vpop.f32.mrf.mxu0  ;;  %v1381_v42 = vpop.f32.mrf.mxu1 }
 0x2e3   :  { %1542 = vpow2.f32 %v1223_v44 }
 0x2ee   :  { %v1541_v45 = vpop.eup %1540 }
 0x2ef   :  { %v490_v46 = vadd.f32 1.0, %v1541_v45 }
 0x2f0   :  { %v1543_v47 = vpop.eup %1542 }
 0x2f1   :  { %1544 = vrcp.f32 %v490_v46  ;;  %v501_v53 = vadd.f32 1.0, %v1543_v47  ;;  %v666_v46 = vunpack.c.h.bf16 %v2012_v48  ;;  %v1230_v48 = vld [vmem:[%s2250_s0 + $0x30] sm:$0xff] }
 0x2f3   :  { %1546 = vrcp.f32 %v501_v53 }
 0x2fe   :  { %v1545_v54 = vpop.eup %1544 }
 0x2ff   :  { %v544_v55 = vmul.f32 %v1545_v54, %v539_v49 }
 0x300   :  { %v1547_v57 = vpop.eup %1546 }
 0x301   :  { %v546_v56 = vadd.f32 %v545_v51, %v544_v55  ;;  %v557_v60 = vmul.f32 %v1547_v57, %v555_v58 }
 0x303   :  { %1548 = vtanh.f32 %v546_v56  ;;  %v676_v56 = vpop.permute.xlu1 %675 }
 0x310   :  { %v1549_v59 = vpop.eup %1548 }
 0x311   :  { %v558_v61 = vsub.f32 %v1967_v26, %v1549_v59 }
 0x313   :  { %v559_v62 = vmul.f32 %v558_v61, %v557_v60 }
 0x315   :  { %v2018_v63 = vsub.f32 %v1967_v26, %v559_v62  ;;  %v606_v26 = vunpack.c.l.bf16 %v1225_v24  ;;  %v727_v62 = vunpack.c.l.bf16 %v1230_v48 }
 0x317   :  { %v561_v17 = vpack.c.bf16 %v2018_v63, %v2018_v63 }
 0x319   :  { %595 = vmatmul.mubr.bf16.vlgmr.msra.gmra.mxu0 %v561_v17  ;;  %1399 = vmatmul.mubr.bf16.vlgmr.msra.gmra.mxu1 %v561_v17 }
 0x31a   :  { %684 = vmatpush1.bf16.msra.mxu0 %v1687_v1  ;;  %1403 = vmatpush3.bf16.msra.mxu1 %v1728_v9 }
 0x31b   :  { %685 = vmatprep.subr.bf16.mxu0 %v1695_v4  ;;  %1404 = vmatprep.subr.bf16.mxu1 %v1640_v2 }
 0x31c   :  { %715 = vmatprep.mubr.bf16.mxu0 %v1641_v3  ;;  %1418 = vmatprep.mubr.msk.bf16.mxu1 %vm1642_vm0, %v1640_v2 }
 0x31e   :  { %686 = vmatpush1.bf16.msra.mxu0 %v1703_v5  ;;  %1405 = vmatpush3.bf16.msra.mxu1 %v1746_v12 }
 0x31f   :  { %687 = vmatprep.subr.bf16.mxu0 %v1710_v6  ;;  %1406 = vmatprep.subr.bf16.mxu1 %v1640_v2 }
 0x322   :  { %688 = vmatpush1.bf16.msra.mxu0 %v1717_v7  ;;  %1407 = vmatpush3.bf16.msra.mxu1 %v1765_v15 }
 0x323   :  { %689 = vmatprep.subr.bf16.mxu0 %v1723_v8  ;;  %1408 = vmatprep.subr.bf16.mxu1 %v1640_v2 }
 0x326   :  { %690 = vmatpush1.bf16.msra.mxu0 %v1734_v10  ;;  %1409 = vmatpush3.bf16.msra.mxu1 %v1787_v19 }
 0x327   :  { %691 = vmatprep.subr.bf16.mxu0 %v1740_v11  ;;  %1410 = vmatprep.subr.bf16.mxu1 %v1640_v2 }
 0x32a   :  { %692 = vmatpush1.bf16.msra.mxu0 %v1752_v13  ;;  %1411 = vmatpush3.bf16.msra.mxu1 %v1809_v23 }
 0x32b   :  { %693 = vmatprep.subr.bf16.mxu0 %v1758_v14  ;;  %1412 = vmatprep.subr.bf16.mxu1 %v1640_v2 }
 0x32e   :  { %694 = vmatpush1.bf16.msra.mxu0 %v1772_v16  ;;  %1413 = vmatpush3.bf16.msra.mxu1 %v1831_v27 }
 0x32f   :  { %695 = vmatprep.subr.bf16.mxu0 %v1781_v18  ;;  %1414 = vmatprep.subr.bf16.mxu1 %v1640_v2 }
 0x332   :  { %696 = vmatpush1.bf16.msra.mxu0 %v1797_v21  ;;  %1415 = vmatpush3.bf16.msra.mxu1 %v1844_v30 }
 0x333   :  { %697 = vmatprep.subr.bf16.mxu0 %v1803_v22  ;;  %1416 = vmatprep.subr.bf16.mxu1 %v1640_v2 }
 0x336   :  { %698 = vmatpush1.bf16.msra.mxu0 %v1819_v25  ;;  %1417 = vmatpush3.bf16.msra.mxu1 %v1854_v31 }
 0x337   :  { %804 = vmatprep.subr.bf16.mxu0 %v1682_v0  ;;  %1422 = vmatprep.subr.bf16.mxu1 %v1640_v2 }
 0x3d9   :  { %v596_v28 = vpop.f32.mrf.mxu0  ;;  %v659_v52 = vpop.f32.mrf.mxu1 }
 0x3da   :  { %v607_v20 = vadd.f32 %v606_v26, %v596_v28  ;;  %v660_v45 = vadd.f32 %v1898_v50, %v659_v52  ;;  %v736_v26 = vrot.slane %v1230_v48, 4 }
 0x3db   :  { %v598_v32 = vpop.f32.mrf.mxu0  ;;  %v1400_v33 = vpop.f32.mrf.mxu1 }
 0x3dc   :  { %v1227_v34 = vmul.f32 -1.442695, %v607_v20  ;;  %v618_v40 = vadd.f32 %v617_v37, %v598_v32  ;;  %v738_v33 = vunpack.c.l.bf16 %v736_v26 }
 0x3dd   :  { %v600_v35 = vpop.f32.mrf.mxu0  ;;  %v662_v36 = vpop.f32.mrf.mxu1 }
 0x3de   :  { %1550 = vpow2.f32 %v1227_v34  ;;  %v1228_v41 = vmul.f32 -1.442695, %v618_v40  ;;  %v2109_v40 = vld [vmem:[%s2250_s0 + $0x38] ss:$12 sps:$4 sm:$0xff]  }
 0x3df   :  { %v601_v38 = vpop.f32.mrf.mxu0  ;;  %v1401_v39 = vpop.f32.mrf.mxu1  ;;  %v908_v48 = vunpack.c.h.bf16 %v2109_v40 }
 0x3e0   :  { %1552 = vpow2.f32 %v1228_v41 }
 0x3eb   :  { %v1551_v42 = vpop.eup %1550 }
 0x3ec   :  { %v611_v43 = vadd.f32 1.0, %v1551_v42  ;;  %v787_v42 = vunpack.c.l.bf16 %v2109_v40  ;;  %v1608_v40 = vld [vmem:[%s2254_s4 + $0x28] sm:$0xff]  }
 0x3ed   :  { %v1553_v44 = vpop.eup %1552 }
 0x3ee   :  { %1554 = vrcp.f32 %v611_v43  ;;  %v622_v47 = vadd.f32 1.0, %v1553_v44 }
 0x3f0   :  { %1556 = vrcp.f32 %v622_v47 }
 0x3fb   :  { %v1555_v49 = vpop.eup %1554 }
 0x3fc   :  { %v665_v51 = vmul.f32 %v1555_v49, %v660_v45 }
 0x3fd   :  { %v1557_v54 = vpop.eup %1556 }
 0x3fe   :  { %v667_v53 = vadd.f32 %v666_v46, %v665_v51  ;;  %v678_v57 = vmul.f32 %v1557_v54, %v676_v56  ;;  %v797_v51 = vpop.permute.xlu0 %796 }
 0x400   :  { %1558 = vtanh.f32 %v667_v53 }
 0x40d   :  { %v1559_v55 = vpop.eup %1558 }
 0x40e   :  { %v679_v58 = vsub.f32 %v2018_v63, %v1559_v55 }
 0x410   :  { %v680_v59 = vmul.f32 %v679_v58, %v678_v57 }
 0x412   :  { %v2064_v60 = vsub.f32 %v2018_v63, %v680_v59 }
 0x414   :  { %v682_v61 = vpack.c.bf16 %v2064_v60, %v2064_v60 }
 0x416   :  { %716 = vmatmul.mubr.bf16.vlgmr.msra.gmra.mxu0 %v682_v61  ;;  %1419 = vmatmul.mubr.bf16.vlgmr.msra.gmra.mxu1 %v682_v61 }
 0x417   :  { %805 = vmatpush1.bf16.msra.mxu0 %v1687_v1  ;;  %1423 = vmatpush3.bf16.msra.mxu1 %v1728_v9 }
 0x418   :  { %806 = vmatprep.subr.bf16.mxu0 %v1695_v4  ;;  %1424 = vmatprep.subr.bf16.mxu1 %v1640_v2 }
 0x419   :  { %836 = vmatprep.mubr.bf16.mxu0 %v1641_v3  ;;  %1438 = vmatprep.mubr.msk.bf16.mxu1 %vm1642_vm0, %v1640_v2 }
 0x41b   :  { %807 = vmatpush1.bf16.msra.mxu0 %v1703_v5  ;;  %1425 = vmatpush3.bf16.msra.mxu1 %v1746_v12 }
 0x41c   :  { %808 = vmatprep.subr.bf16.mxu0 %v1710_v6  ;;  %1426 = vmatprep.subr.bf16.mxu1 %v1640_v2 }
 0x41f   :  { %809 = vmatpush1.bf16.msra.mxu0 %v1717_v7  ;;  %1427 = vmatpush3.bf16.msra.mxu1 %v1765_v15 }
 0x420   :  { %810 = vmatprep.subr.bf16.mxu0 %v1723_v8  ;;  %1428 = vmatprep.subr.bf16.mxu1 %v1640_v2 }
 0x423   :  { %811 = vmatpush1.bf16.msra.mxu0 %v1734_v10  ;;  %1429 = vmatpush3.bf16.msra.mxu1 %v1787_v19 }
 0x424   :  { %812 = vmatprep.subr.bf16.mxu0 %v1740_v11  ;;  %1430 = vmatprep.subr.bf16.mxu1 %v1640_v2 }
 0x427   :  { %813 = vmatpush1.bf16.msra.mxu0 %v1752_v13  ;;  %1431 = vmatpush3.bf16.msra.mxu1 %v1809_v23 }
 0x428   :  { %814 = vmatprep.subr.bf16.mxu0 %v1758_v14  ;;  %1432 = vmatprep.subr.bf16.mxu1 %v1640_v2 }
 0x42b   :  { %815 = vmatpush1.bf16.msra.mxu0 %v1772_v16  ;;  %1433 = vmatpush3.bf16.msra.mxu1 %v1831_v27 }
 0x42c   :  { %816 = vmatprep.subr.bf16.mxu0 %v1781_v18  ;;  %1434 = vmatprep.subr.bf16.mxu1 %v1640_v2 }
 0x42f   :  { %817 = vmatpush1.bf16.msra.mxu0 %v1797_v21  ;;  %1435 = vmatpush3.bf16.msra.mxu1 %v1844_v30 }
 0x430   :  { %818 = vmatprep.subr.bf16.mxu0 %v1803_v22  ;;  %1436 = vmatprep.subr.bf16.mxu1 %v1640_v2 }
 0x433   :  { %819 = vmatpush1.bf16.msra.mxu0 %v1819_v25  ;;  %1437 = vmatpush3.bf16.msra.mxu1 %v1854_v31 }
 0x434   :  { %925 = vmatprep.subr.bf16.mxu0 %v1682_v0  ;;  %1442 = vmatprep.subr.bf16.mxu1 %v1640_v2 }
 0x4d6   :  { %v717_v63 = vpop.f32.mrf.mxu0  ;;  %v780_v17 = vpop.f32.mrf.mxu1 }
 0x4d7   :  { %v728_v24 = vadd.f32 %v727_v62, %v717_v63  ;;  %v781_v41 = vadd.f32 %v1898_v50, %v780_v17 }
 0x4d8   :  { %v719_v28 = vpop.f32.mrf.mxu0  ;;  %v1420_v52 = vpop.f32.mrf.mxu1 }
 0x4d9   :  { %v1232_v20 = vmul.f32 -1.442695, %v728_v24  ;;  %v739_v35 = vadd.f32 %v738_v33, %v719_v28  ;;  %v918_v52 = vpop.permute.xlu1 %917 }
 0x4da   :  { %v721_v29 = vpop.f32.mrf.mxu0  ;;  %v783_v32 = vpop.f32.mrf.mxu1 }
 0x4db   :  { %1560 = vpow2.f32 %v1232_v20  ;;  %v1233_v36 = vmul.f32 -1.442695, %v739_v35  ;;  %v1602_v35 = vld [vmem:[%s2254_s4 + $0x38] sm:$0xff]  }
 0x4dc   :  { %v722_v34 = vpop.f32.mrf.mxu0  ;;  %v1421_v0 = vpop.f32.mrf.mxu1 }
 0x4dd   :  { %1562 = vpow2.f32 %v1233_v36  ;;  %v1601_v0 = vld [vmem:[%s2253_s3 + $0x70] ss:$8 sps:$4 sm:$0xff]   ;;  %v1603_v36 = vld [vmem:[%s2253_s3 + $0x64] ss:$8 sps:$4 sm:$0xff]  }
 0x4e8   :  { %v1561_v37 = vpop.eup %1560 }
 0x4e9   :  { %v732_v38 = vadd.f32 1.0, %v1561_v37  ;;  %v1604_v37 = vld [vmem:[%s2253_s3 + $0x60] ss:$8 sps:$4 sm:$0xff]  }
 0x4ea   :  { %v1563_v39 = vpop.eup %1562 }
 0x4eb   :  { %1564 = vrcp.f32 %v732_v38  ;;  %v743_v43 = vadd.f32 1.0, %v1563_v39  ;;  %v1605_v38 = vld [vmem:[%s2254_s4 + $0x30] sm:$0xff]  }
 0x4ec   :  { %v1606_v39 = vld [vmem:[%s2253_s3 + $0x54] ss:$8 sps:$4 sm:$0xff]  }
 0x4ed   :  { %1566 = vrcp.f32 %v743_v43  ;;  %v1611_v43 = vld [vmem:[%s2253_s3 + $0x34] ss:$8 sps:$4 sm:$0xff]  }
 0x4f8   :  { %v1565_v44 = vpop.eup %1564 }
 0x4f9   :  { %v786_v45 = vmul.f32 %v1565_v44, %v781_v41  ;;  %v1609_v41 = vld [vmem:[%s2253_s3 + $0x44] ss:$8 sps:$4 sm:$0xff]   ;;  %v1612_v44 = vld [vmem:[%s2253_s3 + $0x30] ss:$8 sps:$4 sm:$0xff]  }
 0x4fa   :  { %v1567_v47 = vpop.eup %1566 }
 0x4fb   :  { %v788_v46 = vadd.f32 %v787_v42, %v786_v45  ;;  %v799_v53 = vmul.f32 %v1567_v47, %v797_v51  ;;  %v1610_v42 = vld [vmem:[%s2253_s3 + $0x40] ss:$8 sps:$4 sm:$0xff]   ;;  %v1613_v45 = vld [vmem:[%s2253_s3 + $0x24] ss:$8 sps:$4 sm:$0xff]  }
 0x4fc   :  { %v1617_v47 = vld [vmem:[%s2253_s3 + $0x4] ss:$8 sps:$4 sm:$0xff]  }
 0x4fd   :  { %1568 = vtanh.f32 %v788_v46  ;;  %v1615_v46 = vld [vmem:[%s2253_s3 + $0x14] ss:$8 sps:$4 sm:$0xff]  }
 0x50a   :  { %v1569_v49 = vpop.eup %1568 }
 0x50b   :  { %v800_v54 = vsub.f32 %v2064_v60, %v1569_v49 }
 0x50d   :  { %v801_v55 = vmul.f32 %v800_v54, %v799_v53 }
 0x50f   :  { %v2115_v56 = vsub.f32 %v2064_v60, %v801_v55 }
 0x511   :  { %v803_v57 = vpack.c.bf16 %v2115_v56, %v2115_v56 }
 0x513   :  { %837 = vmatmul.mubr.bf16.vlgmr.msra.gmra.mxu0 %v803_v57  ;;  %1439 = vmatmul.mubr.bf16.vlgmr.msra.gmra.mxu1 %v803_v57 }
 0x514   :  { %926 = vmatpush1.bf16.msra.mxu0 %v1687_v1  ;;  %1443 = vmatpush3.bf16.msra.mxu1 %v1728_v9  ;;  %v1600_v1 = vld [vmem:[%s2253_s3 + $0x74] ss:$8 sps:$4 sm:$0xff]  }
 0x515   :  { %927 = vmatprep.subr.bf16.mxu0 %v1695_v4  ;;  %1444 = vmatprep.subr.bf16.mxu1 %v1640_v2  ;;  %v1235_v4 = vld [vmem:[%s2250_s0 + $0x3c] sm:$0xff] }
 0x516   :  { %957 = vmatprep.mubr.bf16.mxu0 %v1641_v3  ;;  %1458 = vmatprep.mubr.msk.bf16.mxu1 %vm1642_vm0, %v1640_v2  ;;  %v857_v9 = vrot.slane %v1235_v4, 4 }
 0x518   :  { %928 = vmatpush1.bf16.msra.mxu0 %v1703_v5  ;;  %1445 = vmatpush3.bf16.msra.mxu1 %v1746_v12  ;;  %v848_v5 = vunpack.c.l.bf16 %v1235_v4 }
 0x519   :  { %929 = vmatprep.subr.bf16.mxu0 %v1710_v6  ;;  %1446 = vmatprep.subr.bf16.mxu1 %v1640_v2 }
 0x51c   :  { %930 = vmatpush1.bf16.msra.mxu0 %v1717_v7  ;;  %1447 = vmatpush3.bf16.msra.mxu1 %v1765_v15  ;;  %v859_v15 = vunpack.c.l.bf16 %v857_v9 }
 0x51d   :  { %931 = vmatprep.subr.bf16.mxu0 %v1723_v8  ;;  %1448 = vmatprep.subr.bf16.mxu1 %v1640_v2 }
 0x520   :  { %932 = vmatpush1.bf16.msra.mxu0 %v1734_v10  ;;  %1449 = vmatpush3.bf16.msra.mxu1 %v1787_v19 }
 0x521   :  { %933 = vmatprep.subr.bf16.mxu0 %v1740_v11  ;;  %1450 = vmatprep.subr.bf16.mxu1 %v1640_v2 }
 0x524   :  { %934 = vmatpush1.bf16.msra.mxu0 %v1752_v13  ;;  %1451 = vmatpush3.bf16.msra.mxu1 %v1809_v23 }
 0x525   :  { %935 = vmatprep.subr.bf16.mxu0 %v1758_v14  ;;  %1452 = vmatprep.subr.bf16.mxu1 %v1640_v2 }
 0x528   :  { %936 = vmatpush1.bf16.msra.mxu0 %v1772_v16  ;;  %1453 = vmatpush3.bf16.msra.mxu1 %v1831_v27 }
 0x529   :  { %937 = vmatprep.subr.bf16.mxu0 %v1781_v18  ;;  %1454 = vmatprep.subr.bf16.mxu1 %v1640_v2 }
 0x52c   :  { %938 = vmatpush1.bf16.msra.mxu0 %v1797_v21  ;;  %1455 = vmatpush3.bf16.msra.mxu1 %v1844_v30 }
 0x52d   :  { %939 = vmatprep.subr.bf16.mxu0 %v1803_v22  ;;  %1456 = vmatprep.subr.bf16.mxu1 %v1640_v2 }
 0x530   :  { %940 = vmatpush1.bf16.msra.mxu0 %v1819_v25  ;;  %1457 = vmatpush3.bf16.msra.mxu1 %v1854_v31 }
 0x531   :  { %1046 = vmatprep.subr.bf16.mxu0 %v1600_v1  ;;  %1462 = vmatprep.subr.bf16.mxu1 %v1640_v2 }
 0x5d3   :  { %v838_v6 = vpop.f32.mrf.mxu0  ;;  %v901_v7 = vpop.f32.mrf.mxu1 }
 0x5d4   :  { %v849_v8 = vadd.f32 %v848_v5, %v838_v6  ;;  %v902_v61 = vadd.f32 %v1898_v50, %v901_v7 }
 0x5d5   :  { %v840_v10 = vpop.f32.mrf.mxu0  ;;  %v1440_v11 = vpop.f32.mrf.mxu1 }
 0x5d6   :  { %v1237_v12 = vmul.f32 -1.442695, %v849_v8  ;;  %v860_v21 = vadd.f32 %v859_v15, %v840_v10  ;;  %v1241_v10 = vld [vmem:[%s2250_s0 + $0x50] ss:$12 sps:$4 sm:$0xff]  }
 0x5d7   :  { %v842_v13 = vpop.f32.mrf.mxu0  ;;  %v904_v14 = vpop.f32.mrf.mxu1 }
 0x5d8   :  { %1570 = vpow2.f32 %v1237_v12  ;;  %v1238_v22 = vmul.f32 -1.442695, %v860_v21  ;;  %v1029_v12 = vunpack.c.l.bf16 %v1241_v10 }
 0x5d9   :  { %v843_v16 = vpop.f32.mrf.mxu0  ;;  %v1441_v18 = vpop.f32.mrf.mxu1 }
 0x5da   :  { %1572 = vpow2.f32 %v1238_v22  ;;  %v1039_v22 = vpop.permute.xlu0 %1038 }
 0x5e5   :  { %v1571_v58 = vpop.eup %1570 }
 0x5e6   :  { %v853_v59 = vadd.f32 1.0, %v1571_v58 }
 0x5e7   :  { %v1573_v60 = vpop.eup %1572 }
 0x5e8   :  { %1574 = vrcp.f32 %v853_v59  ;;  %v864_v62 = vadd.f32 1.0, %v1573_v60 }
 0x5ea   :  { %1576 = vrcp.f32 %v864_v62  ;;  %v1245_v62 = vld [vmem:[%s2250_s0 + $0x54] sm:$0xff] }
 0x5f5   :  { %v1575_v63 = vpop.eup %1574 }
 0x5f6   :  { %v907_v17 = vmul.f32 %v1575_v63, %v902_v61  ;;  %v1090_v63 = vunpack.c.l.bf16 %v1245_v62 }
 0x5f7   :  { %v1577_v26 = vpop.eup %1576 }
 0x5f8   :  { %v909_v24 = vadd.f32 %v908_v48, %v907_v17  ;;  %v920_v20 = vmul.f32 %v1577_v26, %v918_v52 }
 0x5fa   :  { %1578 = vtanh.f32 %v909_v24 }
 0x607   :  { %v1579_v28 = vpop.eup %1578 }
 0x608   :  { %v921_v29 = vsub.f32 %v2115_v56, %v1579_v28  ;;  %v1099_v28 = vrot.slane %v1245_v62, 4 }
 0x60a   :  { %v922_v32 = vmul.f32 %v921_v29, %v920_v20 }
 0x60c   :  { %v2163_v33 = vsub.f32 %v2115_v56, %v922_v32 }
 0x60e   :  { %v924_v34 = vpack.c.bf16 %v2163_v33, %v2163_v33 }
 0x610   :  { %958 = vmatmul.mubr.bf16.vlgmr.msra.gmra.mxu0 %v924_v34  ;;  %1459 = vmatmul.mubr.bf16.vlgmr.msra.gmra.mxu1 %v924_v34 }
 0x611   :  { %1047 = vmatpush1.bf16.msra.mxu0 %v1601_v0  ;;  %1463 = vmatpush3.bf16.msra.mxu1 %v1602_v35  ;;  %v1101_v0 = vunpack.c.l.bf16 %v1099_v28 }
 0x612   :  { %1048 = vmatprep.subr.bf16.mxu0 %v1603_v36  ;;  %1464 = vmatprep.subr.bf16.mxu1 %v1640_v2 }
 0x613   :  { %1078 = vmatprep.mubr.bf16.mxu0 %v1641_v3  ;;  %1478 = vmatprep.mubr.msk.bf16.mxu1 %vm1642_vm0, %v1640_v2  ;;  %v1607_v3 = vld [vmem:[%s2253_s3 + $0x50] ss:$8 sps:$4 sm:$0xff]  }
 0x615   :  { %1049 = vmatpush1.bf16.msra.mxu0 %v1604_v37  ;;  %1465 = vmatpush3.bf16.msra.mxu1 %v1605_v38 }
 0x616   :  { %1050 = vmatprep.subr.bf16.mxu0 %v1606_v39  ;;  %1466 = vmatprep.subr.bf16.mxu1 %v1640_v2 }
 0x619   :  { %1051 = vmatpush1.bf16.msra.mxu0 %v1607_v3  ;;  %1467 = vmatpush3.bf16.msra.mxu1 %v1608_v40 }
 0x61a   :  { %1052 = vmatprep.subr.bf16.mxu0 %v1609_v41  ;;  %1468 = vmatprep.subr.bf16.mxu1 %v1640_v2  ;;  %v1150_v41 = vunpack.c.h.bf16 %v1241_v10 }
 0x61d   :  { %1053 = vmatpush1.bf16.msra.mxu0 %v1610_v42  ;;  %1469 = vmatpush3.bf16.msra.mxu1 %v1787_v19  ;;  %v1614_v19 = vld [vmem:[%s2253_s3 + $0x20] ss:$8 sps:$4 sm:$0xff]  }
 0x61e   :  { %1054 = vmatprep.subr.bf16.mxu0 %v1611_v43  ;;  %1470 = vmatprep.subr.bf16.mxu1 %v1640_v2 }
 0x621   :  { %1055 = vmatpush1.bf16.msra.mxu0 %v1612_v44  ;;  %1471 = vmatpush3.bf16.msra.mxu1 %v1809_v23  ;;  %v1616_v23 = vld [vmem:[%s2253_s3 + $0x10] ss:$8 sps:$4 sm:$0xff]  }
 0x622   :  { %1056 = vmatprep.subr.bf16.mxu0 %v1613_v45  ;;  %1472 = vmatprep.subr.bf16.mxu1 %v1640_v2 }
 0x625   :  { %1057 = vmatpush1.bf16.msra.mxu0 %v1614_v19  ;;  %1473 = vmatpush3.bf16.msra.mxu1 %v1831_v27  ;;  %v1240_v27 = vld [vmem:[%s2250_s0 + $0x48] sm:$0xff]  ;;  %s1643_s0 = smov [#allocation2]  }
 0x626   :  { %1058 = vmatprep.subr.bf16.mxu0 %v1615_v46  ;;  %1474 = vmatprep.subr.bf16.mxu1 %v1640_v2  ;;  %v969_v49 = vunpack.c.l.bf16 %v1240_v27  ;;  %s1173_s19 = sshll.u32 %s1643_s0, 4  ;;  %s1174_s19 = int_to_ptr.vmem [resolvable:$true] %s1173_s19 }
 0x627   :  { %s1618_s20 = scalar_lea.vmem %s1174_s19, 128  ;;  %p1623_p1 = scmp.lt.s32.totalorder %s1174_s19, %s1174_s19 }
 0x628   :  { %p1619_p0 = scmp.ne.s32.totalorder %s1174_s19, %s1618_s20  ;;  %p1624_p2 = scmp.lt.s32.totalorder %s1618_s20, %s1618_s20 }
 0x629   :  { %1059 = vmatpush1.bf16.msra.mxu0 %v1616_v23  ;;  %1475 = vmatpush3.bf16.msra.mxu1 %v1844_v30  ;;  %v978_v30 = vrot.slane %v1240_v27, 4  ;;  %v1160_v23 = vpop.permute.xlu1 %1159 }
 0x62a   :  { %1060 = vmatprep.subr.bf16.mxu0 %v1617_v47  ;;  %1476 = vmatprep.subr.bf16.mxu1 %v1640_v2  ;;  %p1625_p3 = por %p1624_p2, %p1623_p1 }
 0x62b   :  { %v980_v2 = vunpack.c.l.bf16 %v978_v30 }
 0x62c   :  { %p1626_p4 = pnand %p1625_p3, %p1619_p0 }
 0x62d   :  { %1061 = vmatpush1.bf16.msra.mxu0 %v1819_v25  ;;  %1477 = vmatpush3.bf16.msra.mxu1 %v1854_v31 }
 0x6d0   :  { %v959_v51 = vpop.f32.mrf.mxu0  ;;  %v1022_v53 = vpop.f32.mrf.mxu1 }
 0x6d1   :  { %v970_v54 = vadd.f32 %v969_v49, %v959_v51  ;;  %v1023_v11 = vadd.f32 %v1898_v50, %v1022_v53 }
 0x6d2   :  { %v961_v55 = vpop.f32.mrf.mxu0  ;;  %v1460_v56 = vpop.f32.mrf.mxu1 }
 0x6d3   :  { %v1242_v57 = vmul.f32 -1.442695, %v970_v54  ;;  %v981_v6 = vadd.f32 %v980_v2, %v961_v55 }
 0x6d4   :  { %v963_v1 = vpop.f32.mrf.mxu0  ;;  %v1025_v4 = vpop.f32.mrf.mxu1 }
 0x6d5   :  { %1580 = vpow2.f32 %v1242_v57  ;;  %v1243_v31 = vmul.f32 -1.442695, %v981_v6 }
 0x6d6   :  { %v964_v5 = vpop.f32.mrf.mxu0  ;;  %v1461_v25 = vpop.f32.mrf.mxu1 }
 0x6d7   :  { %1582 = vpow2.f32 %v1243_v31 }
 0x6e2   :  { %v1581_v7 = vpop.eup %1580 }
 0x6e3   :  { %v974_v8 = vadd.f32 1.0, %v1581_v7 }
 0x6e4   :  { %v1583_v9 = vpop.eup %1582 }
 0x6e5   :  { %1584 = vrcp.f32 %v974_v8  ;;  %v985_v13 = vadd.f32 1.0, %v1583_v9 }
 0x6e7   :  { %1586 = vrcp.f32 %v985_v13 }
 0x6f2   :  { %v1585_v14 = vpop.eup %1584 }
 0x6f3   :  { %v1028_v15 = vmul.f32 %v1585_v14, %v1023_v11 }
 0x6f4   :  { %v1587_v18 = vpop.eup %1586 }
 0x6f5   :  { %v1030_v16 = vadd.f32 %v1029_v12, %v1028_v15  ;;  %v1041_v58 = vmul.f32 %v1587_v18, %v1039_v22 }
 0x6f7   :  { %1588 = vtanh.f32 %v1030_v16 }
 0x704   :  { %v1589_v21 = vpop.eup %1588 }
 0x705   :  { %v1042_v59 = vsub.f32 %v2163_v33, %v1589_v21 }
 0x707   :  { %v1043_v60 = vmul.f32 %v1042_v59, %v1041_v58 }
 0x709   :  { %v1044_v61 = vsub.f32 %v2163_v33, %v1043_v60 }
 0x70b   :  { %v1045_v48 = vpack.c.bf16 %v1044_v61, %v1044_v61 }
 0x70d   :  { %1079 = vmatmul.mubr.bf16.vlgmr.msra.gmra.mxu0 %v1045_v48  ;;  %1479 = vmatmul.mubr.bf16.vlgmr.msra.gmra.mxu1 %v1045_v48 }
 0x7cd   :  { %v1080_v17 = vpop.f32.mrf.mxu0  ;;  %v1143_v24 = vpop.f32.mrf.mxu1 }
 0x7ce   :  { %v1091_v26 = vadd.f32 %v1090_v63, %v1080_v17  ;;  %v1144_v40 = vadd.f32 %v1898_v50, %v1143_v24 }
 0x7cf   :  { %v1082_v52 = vpop.f32.mrf.mxu0  ;;  %v1480_v20 = vpop.f32.mrf.mxu1 }
 0x7d0   :  { %v1247_v29 = vmul.f32 -1.442695, %v1091_v26  ;;  %v1102_v36 = vadd.f32 %v1101_v0, %v1082_v52 }
 0x7d1   :  { %v1084_v32 = vpop.f32.mrf.mxu0  ;;  %v1146_v34 = vpop.f32.mrf.mxu1 }
 0x7d2   :  { %1590 = vpow2.f32 %v1247_v29  ;;  %v1248_v37 = vmul.f32 -1.442695, %v1102_v36 }
 0x7d3   :  { %v1085_v33 = vpop.f32.mrf.mxu0  ;;  %v1481_v35 = vpop.f32.mrf.mxu1 }
 0x7d4   :  { %1592 = vpow2.f32 %v1248_v37 }
 0x7df   :  { %v1591_v38 = vpop.eup %1590 }
 0x7e0   :  { %v1095_v39 = vadd.f32 1.0, %v1591_v38 }
 0x7e1   :  { %v1593_v3 = vpop.eup %1592 }
 0x7e2   :  { %1594 = vrcp.f32 %v1095_v39  ;;  %v1106_v42 = vadd.f32 1.0, %v1593_v3 }
 0x7e4   :  { %1596 = vrcp.f32 %v1106_v42 }
 0x7ef   :  { %v1595_v43 = vpop.eup %1594 }
 0x7f0   :  { %v1149_v44 = vmul.f32 %v1595_v43, %v1144_v40 }
 0x7f1   :  { %v1597_v19 = vpop.eup %1596 }
 0x7f2   :  { %v1151_v45 = vadd.f32 %v1150_v41, %v1149_v44  ;;  %v1162_v47 = vmul.f32 %v1597_v19, %v1160_v23 }
 0x7f4   :  { %1598 = vtanh.f32 %v1151_v45 }
 0x801   :  { %v1599_v46 = vpop.eup %1598 }
 0x802   :  { %v1163_v27 = vsub.f32 %v1044_v61, %v1599_v46 }
 0x804   :  { %v1164_v49 = vmul.f32 %v1163_v27, %v1162_v47 }
 0x806   :  { %v1165_v51 = vsub.f32 %v1044_v61, %v1164_v49 }
 0x808   :  { %1166 = vst [vmem:[#allocation2] sm:$0xff] %v1165_v51 }
 0x809   :  { %1629 = shalt.err (!%p1626_p4)
}
 0x80a   :  { %1176 = dma.vmem_to_hbm [thread:$0]  %s1174_s19, 128, %s2256_s6, [#allocation3]  }
 0x80b   :  { %1638 = dma.done.wait [#allocation3], 128  }
 0x80c   :  { %1639 = vsyncadd [#allocation3], 4294967168 }
 0x80d   :  { %1180 = vsyncpa [#allocation3], 1 }

</bundles_post_ra>
